<compile_context>
chip_gen: v7x
topology: tpu7x:2x2x1
jax: 0.10.0
libtpu: 0.0.40
codegen_flags: <defaults>
</compile_context>

<pallas_src>
import jax
import jax.numpy as jnp
from jax.experimental import pallas as pl
from jax.experimental.pallas import tpu as pltpu


def modclassifier_kernel(x_ref, w1_ref, b1_ref, w2_ref, b2_ref, out_ref, acc_ref):
    # x_ref : (TB, C, T_HW) bf16   — streamed HW chunk of the input
    # w1_ref: (C, FEAT)     bf16   — synthetic backbone projection, pre-scaled by 1/(H*W)
    # b1_ref: (1, FEAT)     f32
    # w2_ref: (FEAT, NPAD)  f32    — emb weight, zero-padded to lane-dense width
    # b2_ref: (1, NPAD)     f32
    # out_ref:(TB, NPAD)    f32
    # acc_ref:(TB, C)       f32    — GAP sum accumulator (scratch)
    hw_i = pl.program_id(1)

    @pl.when(hw_i == 0)
    def _():
        acc_ref[...] = jnp.zeros_like(acc_ref)

    # GAP partial sum over this HW chunk; accumulate in f32 (bf16 only on the wire).
    xs = x_ref[...].astype(jnp.float32)            # (TB, C, T_HW)
    acc_ref[...] += jnp.sum(xs, axis=-1)           # (TB, C)

    @pl.when(hw_i == pl.num_programs(1) - 1)
    def _():
        pooled = acc_ref[...]                      # (TB, C); 1/(H*W) folded into w1
        w1f = w1_ref[...].astype(jnp.float32)      # (C, FEAT)
        _, c = pooled.shape

        if c <= 8:
            # C is tiny (image channels): C broadcast FMAs on the VPU; an MXU
            # matmul with K=C would be >90% zero-padding.
            h = pooled[:, 0:1] * w1f[0:1, :]
            for ci in range(1, c):
                h = h + pooled[:, ci:ci + 1] * w1f[ci:ci + 1, :]
        else:
            h = jnp.dot(pooled, w1f, preferred_element_type=jnp.float32)

        h = jnp.maximum(h + b1_ref[...], 0.0)      # ReLU, (TB, FEAT) f32

        # emb head: (TB, FEAT) @ (FEAT, NPAD) on the MXU; lane-dense output store.
        out = jnp.dot(h, w2_ref[...], preferred_element_type=jnp.float32) + b2_ref[...]
        out_ref[...] = out


def mod_classifier_forward(img, w1, b1, w_emb, b_emb, *, tb=None, t_hw=None):
    """img: (B, C, H, W) float32 (NCHW, as in PyTorch).

    w1:(C,1536), b1:(1536,) — synthetic backbone projection.
    w_emb:(2,1536), b_emb:(2,) — self.emb, PyTorch Linear convention.
    """
    B, C, H, W = img.shape
    HW = H * W
    FEAT = w1.shape[1]
    NCLS = w_emb.shape[0]

    # ---- tile selection ------------------------------------------------
    if tb is None:
        for cand in (128, 64, 32, 16, 8):
            if B % cand == 0:
                tb = cand
                break
        else:
            tb = B                      # small batch: single batch tile
    if t_hw is None:
        for cand in (2048, 1024, 512, 256, 128):
            if HW % cand == 0:
                t_hw = cand
                break
        else:
            t_hw = HW                   # full HW if no 128-multiple divides it
    assert B % tb == 0 and (tb % 8 == 0 or tb == B)
    assert HW % t_hw == 0 and (t_hw % 128 == 0 or t_hw == HW)
    nb, nhw = B // tb, HW // t_hw

    # ---- operand preparation --------------------------------------------
    # bf16 on the wire for the dominant x stream and for w1; f32 math in-kernel.
    x = img.reshape(B, C, HW).astype(jnp.bfloat16)
    w1s = (w1.astype(jnp.float32) / float(HW)).astype(jnp.bfloat16)   # fold GAP 1/(H*W)
    b1_2d = b1.reshape(1, FEAT).astype(jnp.float32)

    # Lane-dense padded head: (FEAT, 128) / (1, 128); slice [:, :NCLS] afterwards.
    n_out = max(128, ((NCLS + 127) // 128) * 128)
    w2p = jnp.zeros((FEAT, n_out), jnp.float32).at[:, :NCLS].set(w_emb.T.astype(jnp.float32))
    b2p = jnp.zeros((1, n_out), jnp.float32).at[:, :NCLS].set(b_emb.astype(jnp.float32))

    out_padded = pl.pallas_call(
        modclassifier_kernel,
        out_shape=jax.ShapeDtypeStruct((B, n_out), jnp.float32),
        grid_spec=pltpu.PrefetchScalarGridSpec(
            num_scalar_prefetch=0,
            grid=(nb, nhw),                              # (parallel batch, arbitrary HW-reduce)
            in_specs=[
                pl.BlockSpec((tb, C, t_hw), lambda b, h: (b, 0, h)),   # streamed x chunk
                pl.BlockSpec((C, FEAT), lambda b, h: (0, 0)),          # w1 (fetched once)
                pl.BlockSpec((1, FEAT), lambda b, h: (0, 0)),          # b1
                pl.BlockSpec((FEAT, n_out), lambda b, h: (0, 0)),      # padded emb weight
                pl.BlockSpec((1, n_out), lambda b, h: (0, 0)),         # padded emb bias
            ],
            out_specs=pl.BlockSpec((tb, n_out), lambda b, h: (b, 0)),
            scratch_shapes=[pltpu.VMEM((tb, C), jnp.float32)],         # GAP accumulator
        ),
        compiler_params=pltpu.CompilerParams(
            dimension_semantics=("parallel", "arbitrary"),
            vmem_limit_bytes=32 * 1024 * 1024,   # explicit budget; safe on v5e/v6e/v7x
        ),
    )(x, w1s, b1_2d, w2p, b2p)

    return out_padded[:, :NCLS]


if __name__ == "__main__":
    key = jax.random.PRNGKey(0)
    k_img, k_w1, k_b1, k_w2, k_b2 = jax.random.split(key, 5)

    B, C, H, W = 16, 4, 16, 16
    FEAT = 1536   # feature dim expected by self.emb
    NCLS = 2      # nn.Linear(1536, 2)

    img = jax.random.normal(k_img, (B, C, H, W), dtype=jnp.float32)

    # TODO(synk): real `self.base` comes from a torch.load(...) checkpoint and
    # cannot be reproduced; stand-in backbone = GAP + Linear(C, 1536) + ReLU.
    w1 = jax.random.normal(k_w1, (C, FEAT), dtype=jnp.float32) * 0.05
    b1 = jax.random.normal(k_b1, (FEAT,), dtype=jnp.float32) * 0.01

    # emb = nn.Linear(1536, 2): weight (2, 1536), bias (2,)  (PyTorch convention)
    w_emb = jax.random.normal(k_w2, (NCLS, FEAT), dtype=jnp.float32) * 0.02
    b_emb = jax.random.normal(k_b2, (NCLS,), dtype=jnp.float32) * 0.01

    # tb=8, t_hw=128 -> grid (2, 2): exercises both the parallel batch tiling
    # and the multi-step HW reduction/accumulation path.
    out = mod_classifier_forward(img, w1, b1, w_emb, b_emb, tb=8, t_hw=128)
    out = jax.block_until_ready(out)

    # Pure-JAX reference of the same synthetic forward with the SAME precision
    # policy (bf16-streamed x / w1, f32 accumulation) so tolerance stays tight.
    HW = H * W
    x_bf = img.reshape(B, C, HW).astype(jnp.bfloat16).astype(jnp.float32)
    w1s_bf = (w1 / HW).astype(jnp.bfloat16).astype(jnp.float32)
    pooled_sum = jnp.sum(x_bf, axis=-1)                     # GAP * HW (scale folded in w1)
    h_ref = jnp.maximum(pooled_sum @ w1s_bf + b1, 0.0)
    ref = h_ref @ w_emb.T + b_emb

    assert out.shape == (B, NCLS)
    assert jnp.allclose(out, ref, atol=2e-3, rtol=2e-3), float(jnp.max(jnp.abs(out - ref)))

    print("KERNEL_OK")
</pallas_src>

<mosaic_0001>
module attributes {stable_mosaic.version = 11 : i64} {
  func.func @modclassifier_kernel(%arg0: i32, %arg1: i32, %arg2: memref<8x4x128xbf16, #tpu.memory_space<vmem>>, %arg3: memref<4x1536xbf16, #tpu.memory_space<vmem>>, %arg4: memref<1x1536xf32, #tpu.memory_space<vmem>>, %arg5: memref<1536x128xf32, #tpu.memory_space<vmem>>, %arg6: memref<1x128xf32, #tpu.memory_space<vmem>>, %arg7: memref<8x128xf32, #tpu.memory_space<vmem>>, %arg8: memref<8x4xf32, #tpu.memory_space<vmem>>) attributes {dimension_semantics = [#tpu.dimension_semantics<parallel>, #tpu.dimension_semantics<arbitrary>], iteration_bounds = array<i64: 2, 2>, scalar_prefetch = 0 : i64, scratch_operands = 1 : i64, tpu.core_type = #tpu.core_type<tc>, window_params = [{transform_indices = @transform_0, window_bounds = array<i64: 8, 4, 128>}, {pipeline_mode = #tpu.pipeline_mode<synchronous>, transform_indices = @transform_1, window_bounds = array<i64: 4, 1536>}, {pipeline_mode = #tpu.pipeline_mode<synchronous>, transform_indices = @transform_2, window_bounds = array<i64: 1, 1536>}, {pipeline_mode = #tpu.pipeline_mode<synchronous>, transform_indices = @transform_3, window_bounds = array<i64: 1536, 128>}, {pipeline_mode = #tpu.pipeline_mode<synchronous>, transform_indices = @transform_4, window_bounds = array<i64: 1, 128>}, {transform_indices = @transform_5, window_bounds = array<i64: 8, 128>}]} {
    %c0_i32 = arith.constant 0 : i32
    %0 = arith.cmpi eq, %arg1, %c0_i32 : i32
    %1 = arith.extui %0 : i1 to i32
    %c0_i32_0 = arith.constant 0 : i32
    %2 = arith.cmpi ne, %1, %c0_i32_0 : i32
    scf.if %2 {
      %cst_8 = arith.constant 0.000000e+00 : f32
      %12 = vector.broadcast %cst_8 : f32 to vector<8x4xf32>
      %c0_9 = arith.constant 0 : index
      %c0_10 = arith.constant 0 : index
      %13 = vector.load %arg8[%c0_9, %c0_10] : memref<8x4xf32, #tpu.memory_space<vmem>>, vector<8x4xf32>
      tpu.vector_store %arg8[%c0_9, %c0_10], %12 {strides = array<i32>} : memref<8x4xf32, #tpu.memory_space<vmem>>, vector<8x4xf32>,
    } else {
    }
    %c0 = arith.constant 0 : index
    %c0_1 = arith.constant 0 : index
    %c0_2 = arith.constant 0 : index
    %3 = vector.load %arg2[%c0, %c0_1, %c0_2] : memref<8x4x128xbf16, #tpu.memory_space<vmem>>, vector<8x4x128xbf16>
    %4 = arith.extf %3 : vector<8x4x128xbf16> to vector<8x4x128xf32>
    %c0_3 = arith.constant 0 : index
    %c0_4 = arith.constant 0 : index
    %5 = vector.load %arg8[%c0_3, %c0_4] : memref<8x4xf32, #tpu.memory_space<vmem>>, vector<8x4xf32>
    %cst = arith.constant dense<0.000000e+00> : vector<8x4xf32>
    %6 = vector.multi_reduction <add>, %4, %cst [2] : vector<8x4x128xf32> to vector<8x4xf32>
    %7 = arith.addf %5, %6 : vector<8x4xf32>
    %c0_5 = arith.constant 0 : index
    %c0_6 = arith.constant 0 : index
    %8 = vector.load %arg8[%c0_5, %c0_6] : memref<8x4xf32, #tpu.memory_space<vmem>>, vector<8x4xf32>
    tpu.vector_store %arg8[%c0_5, %c0_6], %7 {strides = array<i32>} : memref<8x4xf32, #tpu.memory_space<vmem>>, vector<8x4xf32>,
    %c1_i32 = arith.constant 1 : i32
    %9 = arith.cmpi eq, %arg1, %c1_i32 : i32
    %10 = arith.extui %9 : i1 to i32
    %c0_i32_7 = arith.constant 0 : i32
    %11 = arith.cmpi ne, %10, %c0_i32_7 : i32
    scf.if %11 {
      %c0_8 = arith.constant 0 : index
      %c0_9 = arith.constant 0 : index
      %12 = vector.load %arg8[%c0_8, %c0_9] : memref<8x4xf32, #tpu.memory_space<vmem>>, vector<8x4xf32>
      %c0_10 = arith.constant 0 : index
      %c0_11 = arith.constant 0 : index
      %13 = vector.load %arg3[%c0_10, %c0_11] : memref<4x1536xbf16, #tpu.memory_space<vmem>>, vector<4x1536xbf16>
      %14 = arith.extf %13 : vector<4x1536xbf16> to vector<4x1536xf32>
      %15 = vector.extract_strided_slice %12 {offsets = [0, 0], sizes = [8, 1], strides = [1, 1]} : vector<8x4xf32> to vector<8x1xf32>
      %16 = vector.extract_strided_slice %14 {offsets = [0, 0], sizes = [1, 1536], strides = [1, 1]} : vector<4x1536xf32> to vector<1x1536xf32>
      %17 = vector.broadcast %15 : vector<8x1xf32> to vector<8x1536xf32>
      %18 = vector.broadcast %16 : vector<1x1536xf32> to vector<8x1536xf32>
      %19 = arith.mulf %17, %18 : vector<8x1536xf32>
      %20 = vector.extract_strided_slice %12 {offsets = [0, 1], sizes = [8, 1], strides = [1, 1]} : vector<8x4xf32> to vector<8x1xf32>
      %21 = vector.extract_strided_slice %14 {offsets = [1, 0], sizes = [1, 1536], strides = [1, 1]} : vector<4x1536xf32> to vector<1x1536xf32>
      %22 = vector.broadcast %20 : vector<8x1xf32> to vector<8x1536xf32>
      %23 = vector.broadcast %21 : vector<1x1536xf32> to vector<8x1536xf32>
      %24 = arith.mulf %22, %23 : vector<8x1536xf32>
      %25 = arith.addf %19, %24 : vector<8x1536xf32>
      %26 = vector.extract_strided_slice %12 {offsets = [0, 2], sizes = [8, 1], strides = [1, 1]} : vector<8x4xf32> to vector<8x1xf32>
      %27 = vector.extract_strided_slice %14 {offsets = [2, 0], sizes = [1, 1536], strides = [1, 1]} : vector<4x1536xf32> to vector<1x1536xf32>
      %28 = vector.broadcast %26 : vector<8x1xf32> to vector<8x1536xf32>
      %29 = vector.broadcast %27 : vector<1x1536xf32> to vector<8x1536xf32>
      %30 = arith.mulf %28, %29 : vector<8x1536xf32>
      %31 = arith.addf %25, %30 : vector<8x1536xf32>
      %32 = vector.extract_strided_slice %12 {offsets = [0, 3], sizes = [8, 1], strides = [1, 1]} : vector<8x4xf32> to vector<8x1xf32>
      %33 = vector.extract_strided_slice %14 {offsets = [3, 0], sizes = [1, 1536], strides = [1, 1]} : vector<4x1536xf32> to vector<1x1536xf32>
      %34 = vector.broadcast %32 : vector<8x1xf32> to vector<8x1536xf32>
      %35 = vector.broadcast %33 : vector<1x1536xf32> to vector<8x1536xf32>
      %36 = arith.mulf %34, %35 : vector<8x1536xf32>
      %37 = arith.addf %31, %36 : vector<8x1536xf32>
      %c0_12 = arith.constant 0 : index
      %c0_13 = arith.constant 0 : index
      %38 = vector.load %arg4[%c0_12, %c0_13] : memref<1x1536xf32, #tpu.memory_space<vmem>>, vector<1x1536xf32>
      %39 = vector.broadcast %38 : vector<1x1536xf32> to vector<8x1536xf32>
      %40 = arith.addf %37, %39 : vector<8x1536xf32>
      %cst_14 = arith.constant 0.000000e+00 : f32
      %41 = vector.broadcast %cst_14 : f32 to vector<8x1536xf32>
      %42 = arith.maximumf %40, %41 : vector<8x1536xf32>
      %c0_15 = arith.constant 0 : index
      %c0_16 = arith.constant 0 : index
      %43 = vector.load %arg5[%c0_15, %c0_16] : memref<1536x128xf32, #tpu.memory_space<vmem>>, vector<1536x128xf32>
      %cst_17 = arith.constant dense<0.000000e+00> : vector<8x128xf32>
      %44 = tpu.matmul %42, %43, %cst_17 {dimension_numbers = #tpu.dot_dimension_numbers<[1], [0], [0], [1], [0, 0, 1, 1], [], []>} : vector<8x1536xf32>, vector<1536x128xf32>, vector<8x128xf32> -> vector<8x128xf32>
      %c0_18 = arith.constant 0 : index
      %c0_19 = arith.constant 0 : index
      %45 = vector.load %arg6[%c0_18, %c0_19] : memref<1x128xf32, #tpu.memory_space<vmem>>, vector<1x128xf32>
      %46 = vector.broadcast %45 : vector<1x128xf32> to vector<8x128xf32>
      %47 = arith.addf %44, %46 : vector<8x128xf32>
      %c0_20 = arith.constant 0 : index
      %c0_21 = arith.constant 0 : index
      %48 = vector.load %arg7[%c0_20, %c0_21] : memref<8x128xf32, #tpu.memory_space<vmem>>, vector<8x128xf32>
      tpu.vector_store %arg7[%c0_20, %c0_21], %47 {strides = array<i32>} : memref<8x128xf32, #tpu.memory_space<vmem>>, vector<8x128xf32>,
    } else {
    }
    return
  }
  func.func @transform_0(%arg0: i32, %arg1: i32) -> (i32, i32, i32) {
    %c0_i32 = arith.constant 0 : i32
    %c0_i32_0 = arith.constant 0 : i32
    return %arg0, %c0_i32, %arg1 : i32, i32, i32
  }
  func.func @transform_1(%arg0: i32, %arg1: i32) -> (i32, i32) {
    %c0_i32 = arith.constant 0 : i32
    %c0_i32_0 = arith.constant 0 : i32
    %c0_i32_1 = arith.constant 0 : i32
    return %c0_i32, %c0_i32_0 : i32, i32
  }
  func.func @transform_2(%arg0: i32, %arg1: i32) -> (i32, i32) {
    %c0_i32 = arith.constant 0 : i32
    %c0_i32_0 = arith.constant 0 : i32
    %c0_i32_1 = arith.constant 0 : i32
    return %c0_i32, %c0_i32_0 : i32, i32
  }
  func.func @transform_3(%arg0: i32, %arg1: i32) -> (i32, i32) {
    %c0_i32 = arith.constant 0 : i32
    %c0_i32_0 = arith.constant 0 : i32
    %c0_i32_1 = arith.constant 0 : i32
    return %c0_i32, %c0_i32_0 : i32, i32
  }
  func.func @transform_4(%arg0: i32, %arg1: i32) -> (i32, i32) {
    %c0_i32 = arith.constant 0 : i32
    %c0_i32_0 = arith.constant 0 : i32
    %c0_i32_1 = arith.constant 0 : i32
    return %c0_i32, %c0_i32_0 : i32, i32
  }
  func.func @transform_5(%arg0: i32, %arg1: i32) -> (i32, i32) {
    %c0_i32 = arith.constant 0 : i32
    %c0_i32_0 = arith.constant 0 : i32
    return %arg0, %c0_i32 : i32, i32
  }
}

</mosaic_0001>

<bundles_post_ra>
// kernel: tpu_custom_call.1
= control target key start
LH: loop header
LB: loop body
LE: loop exit
PB: predicated region body
PF: predicated region fallthrough
CT: control target
= control target key end

     0   :  { %s3580_s0 = inlined_call_operand.hbm [shape: bf16[16,4,256], index: 0, kind: input, shape index: {}]   ;;  %s3581_s1 = inlined_call_operand.hbm [shape: bf16[4,1536], index: 1, kind: input, shape index: {}]   ;;  %s3582_s2 = inlined_call_operand.hbm [shape: f32[1,1536], index: 2, kind: input, shape index: {}]   ;;  %s3583_s3 = inlined_call_operand.hbm [shape: f32[1536,128], index: 3, kind: input, shape index: {}]   ;;  %s3584_s4 = inlined_call_operand.vmem [shape: f32[1,128], index: 4, kind: input, shape index: {}]   ;;  %s3585_s5 = inlined_call_operand.hbm [shape: f32[16,128], index: 5, kind: output, shape index: {}]  }
   0x1   :  { %3642 = sst [smem:[#allocation60_spill]] %s3581_s1 }
   0x2   :  { %3643 = sst [smem:[#allocation61_spill]] %s3582_s2 }
   0x3   :  { %3644 = sst [smem:[#allocation62_spill]] %s3583_s3 }
   0x4   :  { %3645 = sst [smem:[#allocation63_spill]] %s3585_s5 }
   0x5   :  { %10 = vsyncpa [#allocation4], 0 }
   0x6   :  { %12 = vsyncpa [#allocation4 + $0x1], 0 }
   0x7   :  { %13 = vsyncpa [#allocation7], 0 }
   0x8   :  { %14 = vsyncpa [#allocation10], 0 }
   0x9   :  { %15 = vsyncpa [#allocation5], 0 }
   0xa   :  { %17 = vsyncpa [#allocation5 + $0x1], 0  ;;  %s2661_s18 = smov 0   ;;  %s2663_s19 = smov 0  }
   0xb   :  { %s2665_s20 = smov 0   ;;  %s2667_s21 = smov 0  }
   0xc   :  { %s2669_s22 = smov 0   ;;  %s2671_s23 = smov 0  }
   0xd   :  { %s2673_s24 = smov 0   ;;  %s2675_s25 = smov 0  }
   0xe   :  { %s2677_s26 = smov 0   ;;  %s2679_s27 = smov 0  }
   0xf   :  { %s2681_s28 = smov 0  }
  0x10 LB: > { %3646 = sst [smem:[#allocation16_spill]] %s2574_s18  ;;  %s1795_s29 = sadd.s32 4294967295, %s2614_s28   ;;  %s2614_s28 = sphi %s2681_s28, %s23_s28   ;;  %s2610_s27 = sphi %s2679_s27, %s3795_s27   ;;  %s2606_s26 = sphi %s2677_s26, %s3794_s26   ;;  %s2602_s25 = sphi %s2675_s25, %s3793_s25   ;;  %s2598_s24 = sphi %s2673_s24, %s3792_s24   ;;  %s2594_s23 = sphi %s2671_s23, %s3791_s23   ;;  %s2590_s22 = sphi %s2669_s22, %s3790_s22   ;;  %s2586_s21 = sphi %s2667_s21, %s3789_s21   ;;  %s2582_s20 = sphi %s2665_s20, %s3788_s20   ;;  %s2578_s19 = sphi %s2663_s19, %s3787_s19   ;;  %s2574_s18 = sphi %s2661_s18, %s3786_s18  }
  0x11   : > { %3647 = sst [smem:[#allocation17_spill]] %s2614_s28  ;;  %s1796_s30 = sadd.s32 4294967294, %s2614_s28  }
  0x12   : > { %p51_p0 = scmp.ne.s32.totalorder %s2594_s23, %s2590_s22  ;;  %p52_p1 = scmp.eq.s32.totalorder %s2614_s28, 0 }
  0x13   : > { %p57_p2 = scmp.ne.s32.totalorder %s2590_s22, %s2586_s21  ;;  %p2721_p3 = scmp.eq.s32.totalorder %s1795_s29, 0 }
  0x14   : > { %p2726_p4 = por %p52_p1, %p51_p0  ;;  %p164_p5 = scmp.ne.s32.totalorder %s2582_s20, %s2578_s19 }
  0x15   : > { %s3648_s7 = scalar_select %p2721_p3, 1, 0 }
  0x16   : > { %p2734_p6 = por %p2721_p3, %p57_p2  ;;  %p165_p7 = scmp.eq.s32.totalorder %s1795_s29, 3 }
  0x17   : > { %p170_p8 = scmp.ne.s32.totalorder %s2578_s19, %s2574_s18  ;;  %p171_p9 = scmp.eq.s32.totalorder %s1796_s30, 3 }
  0x18   : > { %s3650_s10 = scalar_select %p2734_p6, 1, 0 }
  0x19   : > { %p2740_p10 = por %p165_p7, %p164_p5  ;;  %p1797_p11 = scmp.ge.s32.totalorder %s2614_s28, 1 }
  0x1a   : > { %p2745_p12 = por %p171_p9, %p170_p8  ;;  %p178_p13 = scmp.lt.s32.totalorder %s2614_s28, 5 }
  0x1b   : > { %s3651_s11 = scalar_select %p2740_p10, 1, 0 }
  0x1c   : > { %s3653_s12 = scalar_select %p2745_p12, 1, 0 }
  0x1d   : > { %3652 = sst [smem:[#allocation18_spill]] %s3651_s11  ;;  %p2750_p0 = pnand %p1797_p11, %p178_p13 }
  0x1e   : > { %3654 = sst [smem:[#allocation19_spill]] %s3653_s12  ;;  %s2616_s14 = smov [#allocation6]  }
  0x1f   : > { %s3655_s13 = scalar_select %p2750_p0, 1, 0 }
  0x20   : > { %s191_s15 = sshll.u32 %s2616_s14, 4  ;;  %p2238_p1 = pneg %p2750_p0  ;;  %s192_s15 = int_to_ptr.vmem [resolvable:$true] %s191_s15 }
  0x21   : > { %p2259_p2 = scmp.lt.s32.totalorder %s2614_s28, 4  ;;  %s2617_s21 = smov [#allocation8]  }
  0x22   : > { %p2759_p5 = pnand %p2238_p1, %p2721_p3  ;;  %s202_s29 = sshll.u32 %s2617_s21, 4  ;;  %s203_s29 = int_to_ptr.vmem [resolvable:$true] %s202_s29 }
  0x23   : > { %p2765_p7 = pnand %p2259_p2, %p2726_p4  ;;  %s2618_s30 = smov [#allocation9]  }
  0x24   : > { %s212_s6 = sshll.u32 %s2618_s30, 4  ;;  %s3658_s1 = sld [smem:[#allocation60_spill]]  ;;  %s2793_s6 = int_to_ptr.vmem [resolvable:$true] %s212_s6 }
  0x25   : > { %s3657_s17 = scalar_select %p2765_p7, 1, 0 }
  0x26   : > { %p2777_p9 = pneg %p2759_p5 }
  0x2a   : > { %s2370_s12 = scalar_lea.hbm %s3658_s1, 384 }
  0x2b   : > { %p2371_p8 = scmp.ne.s32.totalorder %s3658_s1, %s2370_s12  ;;  %p2377_p13 = scmp.lt.u32.totalorder %s2370_s12, %s3658_s1 }
  0x2d   : > { %p2373_p4 = pnand %p2777_p9, %p2371_p8 }
  0x2f   : > { %p2374_p11 = pneg %p2373_p4 }
  0x31   : > { %p2379_p1 = pnand %p2377_p13, %p2374_p11 }
  0x33   : > { %2382 = shalt.err (!%p2379_p1)
}
  0x34   : > { %s2383_s8 = scalar_lea.vmem %s192_s15, 384  ;;  %p2391_p3 = scmp.lt.s32.totalorder %s192_s15, %s192_s15 }
  0x35   : > { %p2384_p2 = scmp.ne.s32.totalorder %s192_s15, %s2383_s8  ;;  %p2392_p6 = scmp.lt.s32.totalorder %s2383_s8, %s2383_s8 }
  0x37   : > { %p2386_p12 = pnand %p2384_p2, %p2777_p9  ;;  %p2393_p0 = por %p2392_p6, %p2391_p3 }
  0x39   : > { %p2387_p10 = pneg %p2386_p12 }
  0x3b   : > { %p2394_p7 = pnand %p2393_p0, %p2387_p10 }
  0x3d   : > { %2397 = shalt.err (!%p2394_p7)
}
  0x3e   : > { %2241 = dma.hbm_to_vmem [thread:$0]  (!%p2759_p5), %s3658_s1, 384, %s192_s15, [#allocation7]  }
  0x3f   : > { %s3660_s2 = sld [smem:[#allocation61_spill]] }
  0x45   : > { %s2398_s30 = scalar_lea.hbm %s3660_s2, 192 }
  0x46   : > { %p2399_p3 = scmp.ne.s32.totalorder %s3660_s2, %s2398_s30  ;;  %p2405_p12 = scmp.lt.u32.totalorder %s2398_s30, %s3660_s2 }
  0x48   : > { %p2401_p6 = pnand %p2399_p3, %p2777_p9 }
  0x4a   : > { %p2402_p10 = pneg %p2401_p6 }
  0x4c   : > { %p2407_p0 = pnand %p2405_p12, %p2402_p10 }
  0x4e   : > { %2410 = shalt.err (!%p2407_p0)
}
  0x4f   : > { %s2411_s15 = scalar_lea.vmem %s203_s29, 192  ;;  %p2419_p11 = scmp.lt.s32.totalorder %s203_s29, %s203_s29 }
  0x50   : > { %p2412_p7 = scmp.ne.s32.totalorder %s203_s29, %s2411_s15  ;;  %p2420_p13 = scmp.lt.s32.totalorder %s2411_s15, %s2411_s15 }
  0x52   : > { %p2414_p8 = pnand %p2412_p7, %p2777_p9  ;;  %p2421_p1 = por %p2420_p13, %p2419_p11 }
  0x54   : > { %p2415_p4 = pneg %p2414_p8 }
  0x56   : > { %p2422_p2 = pnand %p2421_p1, %p2415_p4 }
  0x58   : > { %2425 = shalt.err (!%p2422_p2)
}
  0x59   : > { %2244 = dma.hbm_to_vmem [thread:$0]  (!%p2759_p5), %s3660_s2, 192, %s203_s29, [#allocation7]  }
  0x5a   : > { %s3661_s3 = sld [smem:[#allocation62_spill]] }
  0x60   : > { %s2426_s12 = scalar_lea.hbm %s3661_s3, 24576 }
  0x61   : > { %p2427_p3 = scmp.ne.s32.totalorder %s3661_s3, %s2426_s12  ;;  %p2433_p12 = scmp.lt.u32.totalorder %s2426_s12, %s3661_s3 }
  0x63   : > { %p2429_p6 = pnand %p2427_p3, %p2777_p9 }
  0x65   : > { %p2430_p10 = pneg %p2429_p6 }
  0x67   : > { %p2435_p0 = pnand %p2433_p12, %p2430_p10 }
  0x69   : > { %2438 = shalt.err (!%p2435_p0)
}
  0x6a   : > { %s2439_s29 = scalar_lea.vmem %s2793_s6, 24576  ;;  %p2447_p11 = scmp.lt.s32.totalorder %s2793_s6, %s2793_s6 }
  0x6b   : > { %p2440_p7 = scmp.ne.s32.totalorder %s2793_s6, %s2439_s29  ;;  %p2448_p13 = scmp.lt.s32.totalorder %s2439_s29, %s2439_s29 }
  0x6d   : > { %p2442_p8 = pnand %p2440_p7, %p2777_p9  ;;  %p2449_p1 = por %p2448_p13, %p2447_p11 }
  0x6f   : > { %p2443_p4 = pneg %p2442_p8 }
  0x71   : > { %p2450_p2 = pnand %p2449_p1, %p2443_p4 }
  0x73   : > { %2453 = shalt.err (!%p2450_p2)
}
  0x74   : > { %s2619_s15 = smov 128   ;;  %s2620_s18 = smov 8  }
  0x75   : > { %2247 = dma.hbm_to_vmem [thread:$0]  (!%p2759_p5), %s3661_s3, 24576, %s2793_s6, [#allocation10], %s2619_s15, %s2619_s15, %s2620_s18  }
  0x76   : > { %s32_s11 = sadd.s32 1, %s2606_s26  ;;  %s35_s5 = sadd.s32 1, %s2610_s27 }
  0x77   : > { %p33_p9 = scmp.ge.s32.totalorder %s32_s11, 2  ;;  %s229_s12 = sand.u32 1, %s2594_s23  }
  0x78   : > { %s1802_s30 = sshll.u32 %s229_s12, 4  ;;  %s1819_s16 = sshll.u32 %s2610_s27, 4 }
  0x79   : > { %s3797_s11 = smov (%p33_p9, %s32_s11), 0  ;;  %s3799_s5 = smov (!%p33_p9, %s35_s5), %s2610_s27 }
  0x7a   : > { %s40_s14 = ssub.s32 %s2606_s26, %s3797_s11  ;;  %p37_p3 = scmp.ge.s32.totalorder %s3799_s5, 2 }
  0x7b   : > { %s239_s21 = sadd.s32 %s2606_s26, %s1819_s16  ;;  %s233_s6 = scalar_lea.vmem [#allocation3], %s1802_s30 }
  0x7c   : > { %s242_s8 = sshll.u32 %s233_s6, 4  ;;  %s3801_s5 = smov (%p37_p3, %s3799_s5), 0  ;;  %s2848_s8 = int_to_ptr.vmem [resolvable:$true] %s242_s8 }
  0x7d   : > { %s1805_s29 = sshll.u32 %s239_s21, 5  ;;  %s39_s15 = ssub.s32 %s2610_s27, %s3801_s5 }
  0x7e   : > { %s2855_s28 = scalar_lea.hbm %s3580_s0, %s1805_s29  ;;  %s41_s16 = sor.u32 %s40_s14, %s39_s15 }
  0x7f   : > { %p152_p5 = scmp.eq.s32.totalorder %s39_s15, 0  ;;  %p42_p6 = scmp.eq.s32.totalorder %s41_s16, 0 }
  0x80   : > { %s3662_s30 = sadd.s32 1, %s2582_s20  ;;  %s3663_s1 = sadd.s32 1, %s2594_s23 }
  0x81   : > { %s2860_s6 = scalar_select %p152_p5, %s2582_s20, %s3662_s30  }
  0x82   : > { %s2865_s21 = scalar_select %p42_p6, %s2594_s23, %s3663_s1  }
  0x83   : > { %s2867_s2 = scalar_lea.sflag [#allocation4], %s229_s12  ;;  %s2454_s3 = scalar_lea.hbm %s2855_s28, 256 }
  0x84   : > { %p2455_p10 = scmp.ne.s32.totalorder %s2855_s28, %s2454_s3  ;;  %p3664_p12 = scmp.ne.s32.totalorder %s3657_s17, 0 }
  0x85   : > { %s2459_s15 = scalar_lea.hbm %s3580_s0, 1024  ;;  %p2460_p4 = scmp.lt.u32.totalorder %s2855_s28, %s3580_s0 }
  0x86   : > { %p2456_p0 = pneg %p3664_p12  ;;  %p2461_p11 = scmp.lt.u32.totalorder %s2459_s15, %s2454_s3 }
  0x87   : > { %p2463_p1 = scmp.lt.u32.totalorder %s2454_s3, %s2855_s28 }
  0x88   : > { %p2457_p7 = pnand %p2456_p0, %p2455_p10  ;;  %p2462_p13 = por %p2461_p11, %p2460_p4 }
  0x8a   : > { %p2458_p8 = pneg %p2457_p7  ;;  %p2464_p2 = por %p2463_p1, %p2462_p13 }
  0x8c   : > { %p2465_p9 = pnand %p2464_p2, %p2458_p8 }
  0x8e   : > { %2468 = shalt.err (!%p2465_p9)
}
  0x8f   : > { %s2469_s1 = scalar_lea.vmem %s2848_s8, 256  ;;  %s2621_s12 = smov [#allocation3]  }
  0x90   : > { %p2470_p3 = scmp.ne.s32.totalorder %s2848_s8, %s2469_s1  ;;  %s2474_s16 = sshll.u32 %s2621_s12, 4  ;;  %s2475_s16 = int_to_ptr.vmem [resolvable:$false] %s2474_s16 }
  0x91   : > { %s2476_s30 = scalar_lea.vmem %s2475_s16, 512  ;;  %p2477_p10 = scmp.lt.s32.totalorder %s2848_s8, %s2475_s16 }
  0x92   : > { %p2472_p5 = pnand %p2470_p3, %p2456_p0  ;;  %p2478_p7 = scmp.lt.s32.totalorder %s2476_s30, %s2469_s1 }
  0x94   : > { %p2473_p6 = pneg %p2472_p5  ;;  %p2479_p4 = por %p2478_p7, %p2477_p10 }
  0x96   : > { %p2480_p11 = pnand %p2479_p4, %p2473_p6 }
  0x98   : > { %2483 = shalt.err (!%p2480_p11)
}
  0x99   : > { %s2622_s3 = smov 64   ;;  %s2623_s29 = smov 32  }
  0x9a   : > { %s2624_s14 = smov 2   ;;  %p3665_p0 = scmp.ne.s32.totalorder %s3655_s13, 0 }
  0x9b   : > { %2251 = dma.hbm_to_vmem [thread:$0]  (!%p3664_p12), %s2855_s28, 256, %s2848_s8, %s2867_s2, %s2622_s3, %s2623_s29, %s2624_s14  }
  0x9c   : > { %254 = sbr.rel (%p3665_p0) target bundleno = 814 (0x32e), region = 40  ;;  %s256_s15 = sand.u32 (!%p3665_p0), 1, %s2590_s22  }
  0x9d   : > { %s1807_s18 = sshll.u32 (!%p3665_p0), %s256_s15, 4  ;;  %s257_s9 = scalar_lea.sflag (!%p3665_p0), [#allocation4], %s256_s15 }
  0x9e   : > { %s2898_s1 = scalar_lea.vmem (!%p3665_p0), [#allocation3], %s1807_s18  ;;  %p3666_p8 = scmp.ne.s32.totalorder (!%p3665_p0), %s3650_s10, 0 }
  0xa3   : > { %2557 = dma.done.wait (%p3666_p8), %s257_s9, 256  }
  0xa4   : > { %2559 = vsyncadd (%p3666_p8), %s257_s9, 4294967040  ;;  %p3667_p13 = scmp.ne.s32.totalorder %s3648_s7, 0 }
  0xa6   : > { %2561 = dma.done.wait (%p3667_p13), [#allocation7], 576  }
  0xa7   : > { %2563 = vsyncadd (%p3667_p13), [#allocation7], 4294966720 }
  0xa8   : > { %2565 = dma.done.wait (%p3667_p13), [#allocation10], 24576  }
  0xa9   : > { %2567 = vsyncadd (%p3667_p13), [#allocation10], 4294942720  ;;  %s296_s2 = sand.u32 1, %s2578_s19   ;;  %p1812_p12 = scmp.ne.s32.totalorder %s2598_s24, 0 }
  0xaa   : > { %s2915_s13 = sshll.u32 %s296_s2, 3  ;;  %vm304_vm0 = vcmask (!%p1812_p12), 31744   ;;  %v2625_v0 = vmov (!%p1812_p12), 0.0  }
  0xab   : > { %s298_s10 = scalar_lea.vmem [#allocation11], %s2915_s13  ;;  %303 = sbr.rel (%p1812_p12) target bundleno = 178 (0xb2), region = 60  ;;  %305 = vst.msk [vmem:[#allocation2] sm:$0xff] (!%p1812_p12), %vm304_vm0, %v2625_v0 }
  0xb2 PF: > { %v306_v1 = vld [vmem:[%s2898_s1] sm:$0x3]  ;;  %vm323_vm1 = vcmask 1043456   ;;  %v308_v2 = vld [vmem:[%s2898_s1 + $0x4] sm:$0x3]  ;;  %v356_v25 = vlaneseq  ;;  %vm390_vm2 = vcmask 1041409  }
  0xb3   : > { %v314_v3 = vunpack.c.l.bf16 %v306_v1  ;;  %v316_v4 = vunpack.c.l.bf16 %v308_v2  ;;  %v307_v5 = vld [vmem:[%s2898_s1 + $0x2] sm:$0x3]  ;;  %v309_v6 = vld [vmem:[%s2898_s1 + $0x6] sm:$0x3]  ;;  %v310_v9 = vld [vmem:[%s2898_s1 + $0x8] sm:$0x3] }
  0xb4   : > { %v315_v7 = vunpack.c.l.bf16 %v307_v5  ;;  %v317_v8 = vunpack.c.l.bf16 %v309_v6  ;;  %v311_v10 = vld [vmem:[%s2898_s1 + $0xa] sm:$0x3]  ;;  %v318_v15 = vunpack.c.l.bf16 %v310_v9  ;;  %v312_v17 = vld [vmem:[%s2898_s1 + $0xc] sm:$0x3]  ;;  %v313_v18 = vld [vmem:[%s2898_s1 + $0xe] sm:$0x3] }
  0xb5   : > { %v324_v11 = vsel %vm323_vm1, %v314_v3, 0.0  ;;  %v330_v12 = vsel %vm323_vm1, %v316_v4, 0.0  ;;  %v319_v16 = vunpack.c.l.bf16 %v311_v10  ;;  %v320_v21 = vunpack.c.l.bf16 %v312_v17  ;;  %v322_v50 = vld [vmem:[#allocation2] sm:$0xff]  ;;  %p1813_p1 = scmp.ne.s32.totalorder %s2598_s24, 1 }
  0xb6   : > { %325 = vadd.xlane.f32.xlu0 %v324_v11  ;;  %331 = vadd.xlane.f32.xlu1 %v330_v12  ;;  %v327_v13 = vsel %vm323_vm1, %v315_v7, 0.0  ;;  %v333_v14 = vsel %vm323_vm1, %v317_v8, 0.0  ;;  %v336_v19 = vsel %vm323_vm1, %v318_v15, 0.0  ;;  %v321_v22 = vunpack.c.l.bf16 %v313_v18 }
  0xb7   : > { %v339_v20 = vsel %vm323_vm1, %v319_v16, 0.0  ;;  %v342_v23 = vsel %vm323_vm1, %v320_v21, 0.0  ;;  %v357_v26 = vand.u32 127, %v356_v25  ;;  %v2935_v27 = vshrl.u32 %v356_v25, 7 }
  0xb8   : > { %v345_v24 = vsel %vm323_vm1, %v321_v22, 0.0  ;;  %vm392_vm3 = vcmask 1042434   ;;  %vm394_vm4 = vcmask 1043459   ;;  %vm396_vm5 = vcmask 1044484  }
  0xb9   : > { %v360_v30 = vsub.s32 %v357_v26, %v2935_v27  ;;  %vm398_vm6 = vcmask 1045509   ;;  %vm400_vm7 = vcmask 1046534   ;;  %vm402_vm8 = vcmask 1047559  }
  0xba   : > { %328 = vadd.xlane.f32.xlu0 %v327_v13  ;;  %334 = vadd.xlane.f32.xlu1 %v333_v14  ;;  %vm406_vm9 = vcmask 31744  }
  0xbe   : > { %337 = vadd.xlane.f32.xlu0 %v336_v19  ;;  %340 = vadd.xlane.f32.xlu1 %v339_v20 }
  0xc2   : > { %343 = vadd.xlane.f32.xlu0 %v342_v23  ;;  %346 = vadd.xlane.f32.xlu1 %v345_v24 }
 0x143   : > { %v326_v28 = vpop.xlane.xlu0 %325  ;;  %v332_v29 = vpop.xlane.xlu1 %331 }
 0x144   : > { %v361_v33 = vrot.slane %v326_v28, %v360_v30  ;;  %v369_v36 = vrot.slane %v332_v29, %v360_v30 }
 0x147   : > { %v329_v31 = vpop.xlane.xlu0 %328  ;;  %v335_v32 = vpop.xlane.xlu1 %334 }
 0x148   : > { %v365_v34 = vrot.slane %v329_v31, %v360_v30  ;;  %v373_v35 = vrot.slane %v335_v32, %v360_v30 }
 0x14a   : > { %v391_v37 = vsel %vm390_vm2, %v365_v34, %v361_v33 }
 0x14b   : > { %v393_v38 = vsel %vm392_vm3, %v369_v36, %v391_v37  ;;  %v338_v39 = vpop.xlane.xlu0 %337  ;;  %v341_v40 = vpop.xlane.xlu1 %340 }
 0x14c   : > { %v395_v41 = vsel %vm394_vm4, %v373_v35, %v393_v38  ;;  %v377_v42 = vrot.slane %v338_v39, %v360_v30  ;;  %v381_v43 = vrot.slane %v341_v40, %v360_v30 }
 0x14e   : > { %v397_v44 = vsel %vm396_vm5, %v377_v42, %v395_v41 }
 0x14f   : > { %v344_v45 = vpop.xlane.xlu0 %343  ;;  %v347_v46 = vpop.xlane.xlu1 %346  ;;  %v399_v49 = vsel %vm398_vm6, %v381_v43, %v397_v44 }
 0x150   : > { %v385_v47 = vrot.slane %v344_v45, %v360_v30  ;;  %v389_v48 = vrot.slane %v347_v46, %v360_v30  ;;  %411 = sbr.rel (%p1813_p1) target bundleno = 787 (0x313), region = 64 }
 0x152   : > { %v401_v51 = vsel %vm400_vm7, %v385_v47, %v399_v49 }
 0x153   : > { %v403_v52 = vsel %vm402_vm8, %v389_v48, %v401_v51 }
 0x154   : > { %v405_v53 = vadd.f32 %v403_v52, %v322_v50 }
 0x156   : > { %407 = vst.msk [vmem:[#allocation2] sm:$0xff] %vm406_vm9, %v405_v53 }
 0x157   : > { %v1065_v55 = vld [vmem:[#allocation9 + $0x80] sm:$0xff]  ;;  %v2626_v56 = vmov 0   ;;  %v2627_v57 = vmov 2   ;;  %v1066_v58 = vld [vmem:[#allocation9 + $0x88] sm:$0xff]  ;;  %v1067_v4 = vld [vmem:[#allocation9 + $0x90] sm:$0xff]  ;;  %v2628_v15 = vmov 1  }
 0x158   : > { %2365 = vset.pattern.permute.xlu0 %v2626_v56  ;;  %2367 = vset.pattern.permute.xlu1 %v2627_v57  ;;  %v1097_v59 = vld [vmem:[#allocation9 + $0x180] sm:$0xff]  ;;  %v1098_v60 = vld [vmem:[#allocation9 + $0x188] sm:$0xff]  ;;  %v2030_v61 = vpack.c.bf16 %v1066_v58, %v1065_v55  ;;  %v1068_v5 = vld [vmem:[#allocation9 + $0x98] sm:$0xff]  ;;  %v2629_v16 = vmov 3  }
 0x159   : > { %v2062_v62 = vpack.c.bf16 %v1098_v60, %v1097_v59  ;;  %v1049_v63 = vld [vmem:[#allocation9] sm:$0xff]  ;;  %v1050_v0 = vld [vmem:[#allocation9 + $0x8] sm:$0xff]  ;;  %v2034_v7 = vpack.c.bf16 %v1068_v5, %v1067_v4  ;;  %v1099_v8 = vld [vmem:[#allocation9 + $0x190] sm:$0xff] }
 0x15a   : > { %v1081_v1 = vld [vmem:[#allocation9 + $0x100] sm:$0xff]  ;;  %v2032_v2 = vpack.c.bf16 %v1050_v0, %v1049_v63  ;;  %v1082_v3 = vld [vmem:[#allocation9 + $0x108] sm:$0xff]  ;;  %2031 = vmatprep.subr.bf16.mxu0 %v2030_v61  ;;  %v1100_v9 = vld [vmem:[#allocation9 + $0x198] sm:$0xff] }
 0x15b   : > { %2063 = vmatprep.subr.bf16.mxu1 %v2062_v62  ;;  %v2064_v6 = vpack.c.bf16 %v1082_v3, %v1081_v1  ;;  %v1051_v10 = vld [vmem:[#allocation9 + $0x10] sm:$0xff]  ;;  %v2066_v11 = vpack.c.bf16 %v1100_v9, %v1099_v8  ;;  %v1052_v12 = vld [vmem:[#allocation9 + $0x18] sm:$0xff]  ;;  %v1069_v18 = vld [vmem:[#allocation9 + $0xa0] sm:$0xff] }
 0x15c   : > { %2033 = vmatpush3.bf16.msra.mxu0 %v2032_v2  ;;  %v1083_v13 = vld [vmem:[#allocation9 + $0x110] sm:$0xff]  ;;  %v1084_v14 = vld [vmem:[#allocation9 + $0x118] sm:$0xff]  ;;  %v2036_v17 = vpack.c.bf16 %v1052_v12, %v1051_v10  ;;  %v1070_v19 = vld [vmem:[#allocation9 + $0xa8] sm:$0xff] }
 0x15d   : > { %v412_v54 = vld [vmem:[#allocation2] sm:$0xff]  ;;  %v1101_v20 = vld [vmem:[#allocation9 + $0x1a0] sm:$0xff]  ;;  %v2038_v21 = vpack.c.bf16 %v1070_v19, %v1069_v18  ;;  %v1102_v22 = vld [vmem:[#allocation9 + $0x1a8] sm:$0xff]  ;;  %2065 = vmatpush3.bf16.msra.mxu1 %v2064_v6  ;;  %2035 = vmatprep.subr.bf16.mxu0 %v2034_v7  ;;  %v2068_v25 = vpack.c.bf16 %v1084_v14, %v1083_v13 }
 0x15e   : > { %424 = vperm.xlu0 %2365, %v412_v54   ;;  %690 = vperm.xlu1 %2367, %v412_v54   ;;  %v1053_v23 = vld [vmem:[#allocation9 + $0x20] sm:$0xff]  ;;  %v1054_v24 = vld [vmem:[#allocation9 + $0x28] sm:$0xff]  ;;  %v1071_v28 = vld [vmem:[#allocation9 + $0xb0] sm:$0xff]  ;;  %v2070_v29 = vpack.c.bf16 %v1102_v22, %v1101_v20 }
 0x15f   : > { %v1085_v26 = vld [vmem:[#allocation9 + $0x120] sm:$0xff]  ;;  %2067 = vmatprep.subr.bf16.mxu1 %v2066_v11  ;;  %v2040_v30 = vpack.c.bf16 %v1054_v24, %v1053_v23  ;;  %v1086_v31 = vld [vmem:[#allocation9 + $0x128] sm:$0xff]  ;;  %v1072_v32 = vld [vmem:[#allocation9 + $0xb8] sm:$0xff] }
 0x160   : > { %2037 = vmatpush3.bf16.msra.mxu0 %v2036_v17  ;;  %v1103_v33 = vld [vmem:[#allocation9 + $0x1b0] sm:$0xff]  ;;  %v2042_v34 = vpack.c.bf16 %v1072_v32, %v1071_v28  ;;  %v1104_v35 = vld [vmem:[#allocation9 + $0x1b8] sm:$0xff]  ;;  %v1073_v38 = vld [vmem:[#allocation9 + $0xc0] sm:$0xff]  ;;  %v2072_v40 = vpack.c.bf16 %v1086_v31, %v1085_v26 }
 0x161   : > { %2039 = vmatprep.subr.bf16.mxu0 %v2038_v21  ;;  %v1055_v36 = vld [vmem:[#allocation9 + $0x30] sm:$0xff]  ;;  %v1056_v37 = vld [vmem:[#allocation9 + $0x38] sm:$0xff]  ;;  %v1074_v39 = vld [vmem:[#allocation9 + $0xc8] sm:$0xff]  ;;  %2069 = vmatpush3.bf16.msra.mxu1 %v2068_v25  ;;  %v2074_v41 = vpack.c.bf16 %v1104_v35, %v1103_v33 }
 0x162   : > { %2366 = vset.pattern.permute.xlu0 %v2628_v15  ;;  %2368 = vset.pattern.permute.xlu1 %v2629_v16  ;;  %v2044_v42 = vpack.c.bf16 %v1056_v37, %v1055_v36  ;;  %v1087_v43 = vld [vmem:[#allocation9 + $0x130] sm:$0xff]  ;;  %v1088_v44 = vld [vmem:[#allocation9 + $0x138] sm:$0xff]  ;;  %v1105_v45 = vld [vmem:[#allocation9 + $0x1c0] sm:$0xff]  ;;  %v2046_v46 = vpack.c.bf16 %v1074_v39, %v1073_v38  ;;  %v2940_v37 = vsub.s32 4, %v2935_v27  ;;  %v2943_v38 = vsub.s32 5, %v2935_v27 }
 0x163   : > { %554 = vperm.xlu0 %2366, %v412_v54   ;;  %826 = vperm.xlu1 %2368, %v412_v54   ;;  %v1106_v47 = vld [vmem:[#allocation9 + $0x1c8] sm:$0xff]  ;;  %v1057_v48 = vld [vmem:[#allocation9 + $0x40] sm:$0xff]  ;;  %v1075_v50 = vld [vmem:[#allocation9 + $0xd0] sm:$0xff]  ;;  %v2076_v52 = vpack.c.bf16 %v1088_v44, %v1087_v43  ;;  %v2946_v39 = vsub.s32 6, %v2935_v27  ;;  %v2957_v44 = vsub.s32 1, %v2935_v27 }
 0x164   : > { %2071 = vmatprep.subr.bf16.mxu1 %v2070_v29  ;;  %2041 = vmatpush3.bf16.msra.mxu0 %v2040_v30  ;;  %v1058_v49 = vld [vmem:[#allocation9 + $0x48] sm:$0xff]  ;;  %v1076_v51 = vld [vmem:[#allocation9 + $0xd8] sm:$0xff]  ;;  %v2078_v53 = vpack.c.bf16 %v1106_v47, %v1105_v45  ;;  %v1089_v55 = vld [vmem:[#allocation9 + $0x140] sm:$0xff]  ;;  %3668 = vst [vmem:[#allocation20_spill] sm:$0xff] %v2940_v37  ;;  %v2964_v47 = vsub.s32 2, %v2935_v27 }
 0x165   : > { %2043 = vmatprep.subr.bf16.mxu0 %v2042_v34  ;;  %2073 = vmatpush3.bf16.msra.mxu1 %v2072_v40  ;;  %v2048_v54 = vpack.c.bf16 %v1058_v49, %v1057_v48  ;;  %v1090_v56 = vld [vmem:[#allocation9 + $0x148] sm:$0xff]  ;;  %v1107_v57 = vld [vmem:[#allocation9 + $0x1d0] sm:$0xff]  ;;  %v2050_v58 = vpack.c.bf16 %v1076_v51, %v1075_v50  ;;  %v1108_v59 = vld [vmem:[#allocation9 + $0x1d8] sm:$0xff]  ;;  %3669 = vst [vmem:[#allocation21_spill] sm:$0xff] %v2943_v38  ;;  %v2949_v40 = vsub.s32 7, %v2935_v27  ;;  %v2967_v48 = vsub.s32 3, %v2935_v27 }
 0x166   : > { %2075 = vmatprep.subr.bf16.mxu1 %v2074_v41  ;;  %v1059_v60 = vld [vmem:[#allocation9 + $0x50] sm:$0xff]  ;;  %v1060_v61 = vld [vmem:[#allocation9 + $0x58] sm:$0xff]  ;;  %v1077_v62 = vld [vmem:[#allocation9 + $0xe0] sm:$0xff]  ;;  %v2080_v0 = vpack.c.bf16 %v1090_v56, %v1089_v55  ;;  %v2082_v1 = vpack.c.bf16 %v1108_v59, %v1107_v57  ;;  %3670 = vst [vmem:[#allocation22_spill] sm:$0xff] %v2946_v39 }
 0x167   : > { %2369 = vset.pattern.permute.xlu0 %v2629_v16  ;;  %v1078_v63 = vld [vmem:[#allocation9 + $0xe8] sm:$0xff]  ;;  %v2052_v2 = vpack.c.bf16 %v1060_v61, %v1059_v60  ;;  %v1091_v3 = vld [vmem:[#allocation9 + $0x150] sm:$0xff]  ;;  %v1092_v4 = vld [vmem:[#allocation9 + $0x158] sm:$0xff]  ;;  %3671 = vst [vmem:[#allocation23_spill] sm:$0xff] %v2949_v40 }
 0x168   : > { %2045 = vmatpush3.bf16.msra.mxu0 %v2044_v42  ;;  %v1109_v5 = vld [vmem:[#allocation9 + $0x1e0] sm:$0xff]  ;;  %v2054_v6 = vpack.c.bf16 %v1078_v63, %v1077_v62  ;;  %v1110_v7 = vld [vmem:[#allocation9 + $0x1e8] sm:$0xff]  ;;  %v1079_v10 = vld [vmem:[#allocation9 + $0xf0] sm:$0xff]  ;;  %v2084_v12 = vpack.c.bf16 %v1092_v4, %v1091_v3 }
 0x169   : > { %2047 = vmatprep.subr.bf16.mxu0 %v2046_v46  ;;  %2077 = vmatpush3.bf16.msra.mxu1 %v2076_v52  ;;  %v1061_v8 = vld [vmem:[#allocation9 + $0x60] sm:$0xff]  ;;  %v1062_v9 = vld [vmem:[#allocation9 + $0x68] sm:$0xff]  ;;  %v1080_v11 = vld [vmem:[#allocation9 + $0xf8] sm:$0xff]  ;;  %v2086_v13 = vpack.c.bf16 %v1110_v7, %v1109_v5  ;;  %v2961_v46 = vsub.s32 0, %v2935_v27 }
 0x16a   : > { %2079 = vmatprep.subr.bf16.mxu1 %v2078_v53  ;;  %v2056_v14 = vpack.c.bf16 %v1062_v9, %v1061_v8  ;;  %v1093_v15 = vld [vmem:[#allocation9 + $0x160] sm:$0xff]  ;;  %v1094_v16 = vld [vmem:[#allocation9 + $0x168] sm:$0xff]  ;;  %v1111_v17 = vld [vmem:[#allocation9 + $0x1f0] sm:$0xff]  ;;  %v2058_v18 = vpack.c.bf16 %v1080_v11, %v1079_v10 }
 0x16b   : > { %v1112_v19 = vld [vmem:[#allocation9 + $0x1f8] sm:$0xff]  ;;  %v1063_v20 = vld [vmem:[#allocation9 + $0x70] sm:$0xff]  ;;  %v1129_v22 = vld [vmem:[#allocation9 + $0x280] sm:$0xff]  ;;  %v2088_v24 = vpack.c.bf16 %v1094_v16, %v1093_v15 }
 0x16c   : > { %2049 = vmatpush3.bf16.msra.mxu0 %v2048_v54  ;;  %v1064_v21 = vld [vmem:[#allocation9 + $0x78] sm:$0xff]  ;;  %v1130_v23 = vld [vmem:[#allocation9 + $0x288] sm:$0xff]  ;;  %v2090_v25 = vpack.c.bf16 %v1112_v19, %v1111_v17  ;;  %v1095_v28 = vld [vmem:[#allocation9 + $0x170] sm:$0xff] }
 0x16d   : > { %2051 = vmatprep.subr.bf16.mxu0 %v2050_v58  ;;  %2081 = vmatpush3.bf16.msra.mxu1 %v2080_v0  ;;  %v2060_v26 = vpack.c.bf16 %v1064_v21, %v1063_v20  ;;  %v1096_v29 = vld [vmem:[#allocation9 + $0x178] sm:$0xff]  ;;  %v2094_v30 = vpack.c.bf16 %v1130_v23, %v1129_v22  ;;  %v1161_v31 = vld [vmem:[#allocation9 + $0x380] sm:$0xff]  ;;  %v1162_v32 = vld [vmem:[#allocation9 + $0x388] sm:$0xff] }
 0x16e   : > { %2083 = vmatprep.subr.bf16.mxu1 %v2082_v1  ;;  %v2092_v33 = vpack.c.bf16 %v1096_v29, %v1095_v28  ;;  %v2126_v34 = vpack.c.bf16 %v1162_v32, %v1161_v31  ;;  %v413_v35 = vld [vmem:[#allocation6] sm:$0xff]  ;;  %v2953_v42 = vld [vmem:[#allocation8] sm:$0xff]  ;;  %v414_v53 = vld [vmem:[#allocation6 + $0x8] sm:$0xff] }
 0x16f   : > { %v416_v36 = vunpack.c.l.bf16 %v413_v35  ;;  %v2951_v41 = vunpack.c.h.bf16 %v413_v35  ;;  %3672 = vst [vmem:[#allocation24_spill] sm:$0xff] %v2953_v42  ;;  %v2996_v0 = vunpack.c.l.bf16 %v414_v53  ;;  %v3007_v4 = vunpack.c.h.bf16 %v414_v53  ;;  %v3036_v16 = vld [vmem:[#allocation9 + $0x200] sm:$0xff]  ;;  %v3038_v17 = vld [vmem:[#allocation9 + $0x208] sm:$0xff]  ;;  %v3068_v32 = vld [vmem:[#allocation9 + $0x390] sm:$0xff] }
 0x170   : > { %2053 = vmatpush3.bf16.msra.mxu0 %v2052_v2  ;;  %3673 = vst [vmem:[#allocation25_spill] sm:$0xff] %v3036_v16  ;;  %3674 = vst [vmem:[#allocation26_spill] sm:$0xff] %v3038_v17  ;;  %v3044_v20 = vld [vmem:[#allocation9 + $0x308] sm:$0xff]  ;;  %v3074_v35 = vld [vmem:[#allocation9 + $0x218] sm:$0xff] }
 0x171   : > { %2055 = vmatprep.subr.bf16.mxu0 %v2054_v6  ;;  %2085 = vmatpush3.bf16.msra.mxu1 %v2084_v12  ;;  %v440_v43 = vrot.slane %v416_v36, %v2940_v37  ;;  %v564_v45 = vrot.slane %v416_v36, %v2943_v38  ;;  %v700_v49 = vrot.slane %v416_v36, %v2946_v39  ;;  %v3093_v53 = vld [vmem:[#allocation9 + $0x2a8] sm:$0xff]  ;;  %v3118_v60 = vld [vmem:[#allocation9 + $0x2b8] sm:$0xff]  ;;  %v3120_v56 = vld [vmem:[#allocation9 + $0x3b0] sm:$0xff] }
 0x172   : > { %2087 = vmatprep.subr.bf16.mxu1 %v2086_v13  ;;  %v836_v50 = vrot.slane %v416_v36, %v2949_v40  ;;  %v448_v52 = vrot.slane %v2951_v41, %v2940_v37  ;;  %v572_v54 = vrot.slane %v2951_v41, %v2943_v38  ;;  %v708_v55 = vrot.slane %v2951_v41, %v2946_v39  ;;  %v3136_v51 = vld [vmem:[#allocation9 + $0x230] sm:$0xff]  ;;  %v3154_v16 = vld [vmem:[#allocation9 + $0x2c0] sm:$0xff]  ;;  %v3156_v17 = vld [vmem:[#allocation9 + $0x2c8] sm:$0xff] }
 0x173   : > { %v2984_v57 = vrot.slane %v440_v43, %v2961_v46  ;;  %v2987_v58 = vrot.slane %v564_v45, %v2957_v44  ;;  %v844_v59 = vrot.slane %v2951_v41, %v2949_v40  ;;  %v436_v61 = vrot.slane %v416_v36, %v2961_v46  ;;  %3676 = vst [vmem:[#allocation28_spill] sm:$0xff] %v3044_v20  ;;  %v3150_v20 = vld [vmem:[#allocation9 + $0x330] sm:$0xff]  ;;  %v3175_v42 = vld [vmem:[#allocation9 + $0x340] sm:$0xff] }
 0x174   : > { %2057 = vmatpush3.bf16.msra.mxu0 %v2056_v14  ;;  %v560_v62 = vrot.slane %v416_v36, %v2957_v44  ;;  %v696_v63 = vrot.slane %v416_v36, %v2964_v47  ;;  %v2999_v1 = vrot.slane %v700_v49, %v2964_v47  ;;  %v3002_v2 = vrot.slane %v836_v50, %v2967_v48 }
 0x175   : > { %2059 = vmatprep.subr.bf16.mxu0 %v2058_v18  ;;  %2089 = vmatpush3.bf16.msra.mxu1 %v2088_v24  ;;  %v3005_v3 = vrot.slane %v448_v52, %v2961_v46  ;;  %v3010_v5 = vrot.slane %v572_v54, %v2957_v44  ;;  %v3013_v6 = vrot.slane %v708_v55, %v2964_v47  ;;  %v3040_v18 = vld [vmem:[#allocation9 + $0x300] sm:$0xff]  ;;  %v3097_v55 = vld [vmem:[#allocation9 + $0x3a8] sm:$0xff] }
 0x176   : > { %2091 = vmatprep.subr.bf16.mxu1 %v2090_v25  ;;  %v832_v7 = vrot.slane %v416_v36, %v2967_v48  ;;  %v444_v8 = vrot.slane %v2951_v41, %v2961_v46  ;;  %v3019_v9 = vrot.slane %v844_v59, %v2967_v48  ;;  %v568_v10 = vrot.slane %v2951_v41, %v2957_v44  ;;  %v3054_v25 = vld [vmem:[#allocation9 + $0x290] sm:$0xff]  ;;  %v3091_v52 = vld [vmem:[#allocation9 + $0x2a0] sm:$0xff] }
 0x177   : > { %v704_v11 = vrot.slane %v2951_v41, %v2964_v47  ;;  %v840_v12 = vrot.slane %v2951_v41, %v2967_v48  ;;  %v3028_v13 = vrot.slane %v436_v61, %v2961_v46  ;;  %v3031_v14 = vrot.slane %v560_v62, %v2957_v44  ;;  %3675 = vst [vmem:[#allocation27_spill] sm:$0xff] %v3040_v18  ;;  %v3076_v36 = vld [vmem:[#allocation9 + $0x310] sm:$0xff]  ;;  %v3078_v41 = vld [vmem:[#allocation9 + $0x318] sm:$0xff]  ;;  %v3095_v54 = vld [vmem:[#allocation9 + $0x3a0] sm:$0xff] }
 0x178   : > { %2061 = vmatpush3.bf16.msra.mxu0 %v2060_v26  ;;  %v3034_v15 = vrot.slane %v696_v63, %v2964_v47  ;;  %v456_v19 = vrot.slane %v2996_v0, %v2940_v37  ;;  %v580_v21 = vrot.slane %v2996_v0, %v2943_v38  ;;  %v716_v22 = vrot.slane %v2996_v0, %v2946_v39  ;;  %v3056_v26 = vld [vmem:[#allocation9 + $0x298] sm:$0xff]  ;;  %v3099_v59 = vld [vmem:[#allocation9 + $0x220] sm:$0xff]  ;;  %v3101_v61 = vld [vmem:[#allocation9 + $0x228] sm:$0xff] }
 0x179   : > { %2095 = vmatprep.subr.bf16.mxu0 %v2094_v30  ;;  %2093 = vmatpush3.bf16.msra.mxu1 %v2092_v33  ;;  %v852_v23 = vrot.slane %v2996_v0, %v2949_v40  ;;  %v464_v24 = vrot.slane %v3007_v4, %v2940_v37  ;;  %3677 = vst [vmem:[#allocation29_spill] sm:$0xff] %v3054_v25  ;;  %3678 = vst [vmem:[#allocation30_spill] sm:$0xff] %v3056_v26  ;;  %v3070_v33 = vld [vmem:[#allocation9 + $0x398] sm:$0xff]  ;;  %v415_v37 = vld [vmem:[#allocation6 + $0x10] sm:$0xff] }
 0x17a   : > { %2127 = vmatprep.subr.bf16.mxu1 %v2126_v34  ;;  %v3059_v28 = vrot.slane %v832_v7, %v2967_v48  ;;  %v3062_v29 = vrot.slane %v444_v8, %v2961_v46  ;;  %v588_v30 = vrot.slane %v3007_v4, %v2943_v38  ;;  %v724_v31 = vrot.slane %v3007_v4, %v2946_v39  ;;  %v3072_v34 = vld [vmem:[#allocation9 + $0x210] sm:$0xff]  ;;  %v3122_v62 = vld [vmem:[#allocation9 + $0x3b8] sm:$0xff]  ;;  %v3158_v38 = vld [vmem:[#allocation9 + $0x3c0] sm:$0xff] }
 0x17b   : > { %3679 = vst [vmem:[#allocation31_spill] sm:$0xff] %v3068_v32  ;;  %3680 = vst [vmem:[#allocation32_spill] sm:$0xff] %v3076_v36  ;;  %v3081_v43 = vrot.slane %v568_v10, %v2957_v44  ;;  %v3084_v45 = vrot.slane %v704_v11, %v2964_v47  ;;  %v3087_v49 = vrot.slane %v840_v12, %v2967_v48  ;;  %v3112_v10 = vld [vmem:[#allocation9 + $0x320] sm:$0xff]  ;;  %v3114_v11 = vld [vmem:[#allocation9 + $0x328] sm:$0xff]  ;;  %v3189_v36 = vunpack.c.l.bf16 %v415_v37 }
 0x17c   : > { %3681 = vst [vmem:[#allocation33_spill] sm:$0xff] %v3078_v41  ;;  %v860_v50 = vrot.slane %v3007_v4, %v2949_v40  ;;  %3682 = vst [vmem:[#allocation34_spill] sm:$0xff] %v3091_v52  ;;  %v3108_v7 = vrot.slane %v456_v19, %v2961_v46  ;;  %v3116_v12 = vld [vmem:[#allocation9 + $0x2b0] sm:$0xff]  ;;  %v3125_v63 = vrot.slane %v580_v21, %v2957_v44  ;;  %v3138_v39 = vld [vmem:[#allocation9 + $0x238] sm:$0xff] }
 0x17d   : > { %3683 = vst [vmem:[#allocation35_spill] sm:$0xff] %v3095_v54  ;;  %3684 = vst [vmem:[#allocation36_spill] sm:$0xff] %v3097_v55  ;;  %v3128_v19 = vrot.slane %v716_v22, %v2964_v47  ;;  %v3131_v8 = vrot.slane %v852_v23, %v2967_v48  ;;  %v3134_v27 = vrot.slane %v464_v24, %v2961_v46  ;;  %v3152_v24 = vld [vmem:[#allocation9 + $0x338] sm:$0xff]  ;;  %v3171_v26 = vld [vmem:[#allocation9 + $0x240] sm:$0xff] }
 0x17e   : > { %3685 = vst [vmem:[#allocation37_spill] sm:$0xff] %v3099_v59  ;;  %3686 = vst [vmem:[#allocation38_spill] sm:$0xff] %v3101_v61  ;;  %v3141_v18 = vrot.slane %v588_v30, %v2957_v44  ;;  %v3144_v21 = vrot.slane %v724_v31, %v2964_v47  ;;  %v3160_v30 = vld [vmem:[#allocation9 + $0x3c8] sm:$0xff]  ;;  %v3163_v31 = vrot.slane %v860_v50, %v2967_v48  ;;  %v3185_v23 = vld [vmem:[#allocation9 + $0x2d0] sm:$0xff] }
 0x17f   : > { %3687 = vst [vmem:[#allocation39_spill] sm:$0xff] %v3112_v10  ;;  %3688 = vst [vmem:[#allocation40_spill] sm:$0xff] %v3116_v12  ;;  %v3173_v40 = vld [vmem:[#allocation9 + $0x248] sm:$0xff]  ;;  %v3187_v25 = vld [vmem:[#allocation9 + $0x2d8] sm:$0xff]  ;;  %v452_v61 = vrot.slane %v2996_v0, %v2961_v46  ;;  %v576_v50 = vrot.slane %v2996_v0, %v2957_v44  ;;  %v468_v12 = vrot.slane %v3189_v36, %v2961_v46 }
 0x180   : > { %3689 = vst [vmem:[#allocation41_spill] sm:$0xff] %v3118_v60  ;;  %3690 = vst [vmem:[#allocation42_spill] sm:$0xff] %v3120_v56  ;;  %v3183_v32 = vld [vmem:[#allocation9 + $0x348] sm:$0xff]  ;;  %v3197_v54 = vld [vmem:[#allocation9 + $0x3d0] sm:$0xff]  ;;  %v712_v56 = vrot.slane %v2996_v0, %v2964_v47 }
 0x181   : > { %3691 = vst [vmem:[#allocation43_spill] sm:$0xff] %v3122_v62  ;;  %3692 = vst [vmem:[#allocation44_spill] sm:$0xff] %v3131_v8  ;;  %v3199_v22 = vld [vmem:[#allocation9 + $0x3d8] sm:$0xff]  ;;  %v3201_v59 = vld [vmem:[#allocation9 + $0x250] sm:$0xff]  ;;  %v848_v62 = vrot.slane %v2996_v0, %v2967_v48  ;;  %v3246_v10 = vrot.slane %v452_v61, %v2961_v46  ;;  %v3249_v0 = vrot.slane %v576_v50, %v2957_v44 }
 0x182   : > { %3693 = vst [vmem:[#allocation45_spill] sm:$0xff] %v3136_v51  ;;  %3694 = vst [vmem:[#allocation46_spill] sm:$0xff] %v3138_v39  ;;  %v3207_v52 = vld [vmem:[#allocation9 + $0x258] sm:$0xff]  ;;  %v3209_v41 = vld [vmem:[#allocation9 + $0x350] sm:$0xff]  ;;  %v460_v39 = vrot.slane %v3007_v4, %v2961_v46  ;;  %v592_v61 = vrot.slane %v3189_v36, %v2957_v44  ;;  %v728_v50 = vrot.slane %v3189_v36, %v2964_v47 }
 0x183   : > { %3695 = vst [vmem:[#allocation47_spill] sm:$0xff] %v3150_v20  ;;  %3696 = vst [vmem:[#allocation48_spill] sm:$0xff] %v3158_v38  ;;  %v3211_v8 = vld [vmem:[#allocation9 + $0x358] sm:$0xff]  ;;  %v3273_v60 = vrot.slane %v468_v12, %v2961_v46 }
 0x184   : > { %3697 = vst [vmem:[#allocation49_spill] sm:$0xff] %v3175_v42  ;;  %3698 = vst [vmem:[#allocation50_spill] sm:$0xff] %v3183_v32  ;;  %v3260_v38 = vrot.slane %v460_v39, %v2961_v46 }
 0x185   : > { %3699 = vst [vmem:[#allocation51_spill] sm:$0xff] %v3185_v23  ;;  %3700 = vst [vmem:[#allocation52_spill] sm:$0xff] %v3187_v25  ;;  %v3252_v23 = vrot.slane %v712_v56, %v2964_v47  ;;  %v3255_v25 = vrot.slane %v848_v62, %v2967_v48 }
 0x186   : > { %3701 = vst [vmem:[#allocation53_spill] sm:$0xff] %v3197_v54  ;;  %3702 = vst [vmem:[#allocation54_spill] sm:$0xff] %v3199_v22 }
 0x187   : > { %3703 = vst [vmem:[#allocation55_spill] sm:$0xff] %v3201_v59  ;;  %3704 = vst [vmem:[#allocation56_spill] sm:$0xff] %v3207_v52  ;;  %v3262_v59 = vunpack.c.h.bf16 %v415_v37 }
 0x188   : > { %3705 = vst [vmem:[#allocation57_spill] sm:$0xff] %v3209_v41  ;;  %3706 = vst [vmem:[#allocation58_spill] sm:$0xff] %v3211_v8 }
 0x189   : > { %3707 = vst [vmem:[#allocation59_spill] sm:$0xff] %v3255_v25 }
 0x1dd   : > { %v3235_v20 = vpop.permute.xlu0 %424  ;;  %v3237_v55 = vpop.permute.xlu1 %690 }
 0x1de   : > { %v542_v56 = vmul.f32 %v2984_v57, %v3235_v20  ;;  %v802_v62 = vmul.f32 %v2999_v1, %v3237_v55  ;;  %v544_v37 = vmul.f32 %v3005_v3, %v3235_v20  ;;  %v804_v51 = vmul.f32 %v3013_v6, %v3237_v55 }
 0x1df   : > { %v541_v41 = vmul.f32 %v3028_v13, %v3235_v20  ;;  %v801_v57 = vmul.f32 %v3034_v15, %v3237_v55  ;;  %v543_v12 = vmul.f32 %v3062_v29, %v3235_v20  ;;  %v803_v39 = vmul.f32 %v3084_v45, %v3237_v55 }
 0x1e0   : > { %v546_v3 = vmul.f32 %v3108_v7, %v3235_v20  ;;  %v806_v6 = vmul.f32 %v3128_v19, %v3237_v55  ;;  %v548_v52 = vmul.f32 %v3134_v27, %v3235_v20  ;;  %v808_v29 = vmul.f32 %v3144_v21, %v3237_v55 }
 0x1e2   : > { %v3285_v8 = vpop.permute.xlu0 %554  ;;  %v3287_v1 = vpop.permute.xlu1 %826 }
 0x1e3   : > { %v666_v13 = vmul.f32 %v2987_v58, %v3285_v8  ;;  %v668_v15 = vmul.f32 %v3010_v5, %v3285_v8  ;;  %v938_v45 = vmul.f32 %v3002_v2, %v3287_v1  ;;  %v940_v7 = vmul.f32 %v3019_v9, %v3287_v1 }
 0x1e4   : > { %v665_v19 = vmul.f32 %v3031_v14, %v3285_v8  ;;  %v667_v58 = vmul.f32 %v3081_v43, %v3285_v8  ;;  %v937_v27 = vmul.f32 %v3059_v28, %v3287_v1  ;;  %v670_v21 = vmul.f32 %v3125_v63, %v3285_v8  ;;  %v3708_v43 = vld [vmem:[#allocation44_spill] sm:$0xff] }
 0x1e5   : > { %v678_v54 = vadd.f32 %v666_v13, %v542_v56  ;;  %v680_v5 = vadd.f32 %v668_v15, %v544_v37  ;;  %v939_v2 = vmul.f32 %v3087_v49, %v3287_v1  ;;  %v672_v9 = vmul.f32 %v3141_v18, %v3285_v8 }
 0x1e6   : > { %v677_v22 = vadd.f32 %v665_v19, %v541_v41  ;;  %v679_v25 = vadd.f32 %v667_v58, %v543_v12  ;;  %v682_v32 = vadd.f32 %v670_v21, %v546_v3  ;;  %v942_v56 = vmul.f32 %v3708_v43, %v3287_v1  ;;  %v3714_v58 = vld [vmem:[#allocation21_spill] sm:$0xff] }
 0x1e7   : > { %v814_v14 = vadd.f32 %v802_v62, %v678_v54  ;;  %v816_v42 = vadd.f32 %v804_v51, %v680_v5  ;;  %v684_v28 = vadd.f32 %v672_v9, %v548_v52  ;;  %v944_v63 = vmul.f32 %v3163_v31, %v3287_v1  ;;  %v3709_v62 = vld [vmem:[#allocation24_spill] sm:$0xff] }
 0x1e8   : > { %v813_v37 = vadd.f32 %v801_v57, %v677_v22  ;;  %v815_v13 = vadd.f32 %v803_v39, %v679_v25  ;;  %v818_v15 = vadd.f32 %v806_v6, %v682_v32  ;;  %v476_v49 = vrot.slane %v3262_v59, %v2961_v46 }
 0x1e9   : > { %v950_v41 = vadd.f32 %v938_v45, %v814_v14  ;;  %v952_v12 = vadd.f32 %v940_v7, %v816_v42  ;;  %v820_v54 = vadd.f32 %v808_v29, %v684_v28  ;;  %v652_v51 = vrot.slane %v592_v61, %v2957_v44  ;;  %v3716_v14 = vld [vmem:[#allocation23_spill] sm:$0xff] }
 0x1ea   : > { %v949_v19 = vadd.f32 %v937_v27, %v813_v37  ;;  %v951_v18 = vadd.f32 %v939_v2, %v815_v13  ;;  %v3710_v3 = vrot.slane %v3709_v62, %v2957_v44  ;;  %v3711_v25 = vrot.slane %v3709_v62, %v2967_v48 }
 0x1eb   : > { %v954_v31 = vadd.f32 %v942_v56, %v818_v15  ;;  %v600_v42 = vrot.slane %v3262_v59, %v2957_v44  ;;  %v3712_v32 = vrot.slane %v3709_v62, %v2961_v46  ;;  %v3713_v57 = vrot.slane %v3709_v62, %v2964_v47 }
 0x1ec   : > { %v1026_v22 = vadd.f32 %v3710_v3, %v950_v41  ;;  %v1028_v52 = vadd.f32 %v3711_v25, %v952_v12  ;;  %v956_v6 = vadd.f32 %v944_v63, %v820_v54  ;;  %v736_v29 = vrot.slane %v3262_v59, %v2964_v47  ;;  %v3720_v54 = vld [vmem:[#allocation25_spill] sm:$0xff]  ;;  %v3723_v25 = vld [vmem:[#allocation27_spill] sm:$0xff] }
 0x1ed   : > { %v1025_v39 = vadd.f32 %v3712_v32, %v949_v19  ;;  %v1027_v61 = vadd.f32 %v3713_v57, %v951_v18  ;;  %v3715_v5 = vrot.slane %v3709_v62, %v3714_v58  ;;  %v872_v21 = vrot.slane %v3262_v59, %v2967_v48  ;;  %v3719_v18 = vld [vmem:[#allocation26_spill] sm:$0xff] }
 0x1ee   : > { %v1038_v45 = vmax.f32 %v1026_v22, 0.0  ;;  %v1040_v7 = vmax.f32 %v1028_v52, 0.0  ;;  %v3717_v43 = vrot.slane %v3709_v62, %v3716_v14  ;;  %v788_v37 = vrot.slane %v728_v50, %v2964_v47  ;;  %v3722_v22 = vld [vmem:[#allocation28_spill] sm:$0xff] }
 0x1ef   : > { %v1030_v27 = vadd.f32 %v3715_v5, %v954_v31  ;;  %v1037_v2 = vmax.f32 %v1025_v39, 0.0  ;;  %v1039_v9 = vmax.f32 %v1027_v61, 0.0  ;;  %v720_v13 = vrot.slane %v3007_v4, %v2964_v47  ;;  %v3731_v5 = vld [vmem:[#allocation20_spill] sm:$0xff] }
 0x1f0   : > { %v1032_v56 = vadd.f32 %v3717_v43, %v956_v6  ;;  %1312 = vmatprep.mubr.f32.mxu0 %v1038_v45  ;;  %1382 = vmatprep.mubr.f32.mxu1 %v1040_v7  ;;  %v856_v28 = vrot.slane %v3007_v4, %v2967_v48  ;;  %v3718_v63 = vrot.slane %v3189_v36, %v2967_v48  ;;  %v3726_v6 = vld [vmem:[#allocation30_spill] sm:$0xff]  ;;  %v3727_v45 = vld [vmem:[#allocation29_spill] sm:$0xff] }
 0x1f1   : > { %1313 = vmatmul.mubr.f32.vlgmr.msra.gmra.mrb[0].mxu0 %v1037_v2  ;;  %1383 = vmatmul.mubr.f32.vlgmr.msra.gmra.mrb[0].mxu1 %v1039_v9  ;;  %v1042_v12 = vmax.f32 %v1030_v27, 0.0  ;;  %v536_v19 = vrot.slane %v476_v49, %v2961_v46  ;;  %v660_v50 = vrot.slane %v600_v42, %v2957_v44  ;;  %v3721_v3 = vpack.c.bf16 %v3719_v18, %v3720_v54  ;;  %v3736_v18 = vld [vmem:[#allocation34_spill] sm:$0xff]  ;;  %v3739_v54 = vld [vmem:[#allocation35_spill] sm:$0xff] }
 0x1f2   : > { %v924_v41 = vrot.slane %v3718_v63, %v2967_v48  ;;  %v1044_v15 = vmax.f32 %v1032_v56, 0.0  ;;  %v3724_v52 = vpack.c.bf16 %v3722_v22, %v3723_v25  ;;  %v549_v31 = vmul.f32 %v3273_v60, %v3235_v20  ;;  %v3729_v60 = vld [vmem:[#allocation31_spill] sm:$0xff]  ;;  %v3734_v63 = vld [vmem:[#allocation32_spill] sm:$0xff] }
 0x1f3   : > { %2097 = vmatpush3.bf16.msra.mxu0 %v3721_v3  ;;  %v796_v32 = vrot.slane %v736_v29, %v2964_v47  ;;  %v932_v39 = vrot.slane %v872_v21, %v2967_v48  ;;  %1452 = vmatprep.mubr.f32.mxu0 %v1042_v12  ;;  %v3725_v49 = vrot.slane %v3007_v4, %v2957_v44  ;;  %v3389_v4 = vld [vmem:[#allocation8 + $0x8] sm:$0xf] }
 0x1f4   : > { %2129 = vmatpush3.bf16.msra.mxu1 %v3724_v52  ;;  %1522 = vmatprep.mubr.f32.mxu1 %v1044_v15  ;;  %v673_v57 = vmul.f32 %v652_v51, %v3285_v8  ;;  %v809_v61 = vmul.f32 %v788_v37, %v3237_v55  ;;  %v3728_v7 = vpack.c.bf16 %v3726_v6, %v3727_v45  ;;  %v3733_v37 = vld [vmem:[#allocation33_spill] sm:$0xff]  ;;  %v3742_v6 = vld [vmem:[#allocation38_spill] sm:$0xff] }
 0x1f5   : > { %v644_v42 = vrot.slane %v3725_v49, %v2957_v44  ;;  %v3730_v29 = vpack.c.bf16 %v3070_v33, %v3729_v60  ;;  %v472_v27 = vrot.slane %v3189_v36, %v3731_v5  ;;  %v596_v21 = vrot.slane %v3189_v36, %v3714_v58  ;;  %v3743_v45 = vld [vmem:[#allocation37_spill] sm:$0xff] }
 0x1f6   : > { %2099 = vmatprep.subr.bf16.mxu0 %v3728_v7  ;;  %v945_v51 = vmul.f32 %v924_v41, %v3287_v1  ;;  %v604_v2 = vrot.slane %v3262_v59, %v3714_v58  ;;  %v685_v9 = vadd.f32 %v673_v57, %v549_v31  ;;  %v551_v43 = vmul.f32 %v536_v19, %v3235_v20  ;;  %v3741_v31 = vld [vmem:[#allocation22_spill] sm:$0xff] }
 0x1f7   : > { %2131 = vmatprep.subr.bf16.mxu1 %v3730_v29  ;;  %v675_v56 = vmul.f32 %v660_v50, %v3285_v8  ;;  %v3732_v33 = vpack.c.bf16 %v3074_v35, %v3072_v34  ;;  %v3735_v12 = vpack.c.bf16 %v3733_v37, %v3734_v63  ;;  %v480_v15 = vrot.slane %v3262_v59, %v3731_v5  ;;  %v3738_v50 = vld [vmem:[#allocation36_spill] sm:$0xff] }
 0x1f8   : > { %v811_v41 = vmul.f32 %v796_v32, %v3237_v55  ;;  %v947_v58 = vmul.f32 %v932_v39, %v3287_v1  ;;  %v3737_v19 = vpack.c.bf16 %v3093_v53, %v3736_v18  ;;  %v3740_v3 = vpack.c.bf16 %v3738_v50, %v3739_v54  ;;  %v1142_v18 = vld [vmem:[#allocation9 + $0x2e8] sm:$0xff] }
 0x1f9   : > { %2101 = vmatpush3.bf16.msra.mxu0 %v3732_v33  ;;  %2133 = vmatpush3.bf16.msra.mxu1 %v3735_v12  ;;  %v821_v34 = vadd.f32 %v809_v61, %v685_v9  ;;  %v1000_v35 = vrot.slane %v3389_v4, %v2961_v46  ;;  %v687_v22 = vadd.f32 %v675_v56, %v551_v43  ;;  %v3748_v9 = vld [vmem:[#allocation40_spill] sm:$0xff]  ;;  %v3750_v56 = vld [vmem:[#allocation43_spill] sm:$0xff]  ;;  %v3751_v33 = vld [vmem:[#allocation42_spill] sm:$0xff] }
 0x1fa   : > { %2103 = vmatprep.subr.bf16.mxu0 %v3737_v19  ;;  %2135 = vmatprep.subr.bf16.mxu1 %v3740_v3  ;;  %v780_v25 = vrot.slane %v720_v13, %v2964_v47  ;;  %v656_v52 = vrot.slane %v596_v21, %v2957_v44  ;;  %v732_v32 = vrot.slane %v3189_v36, %v3741_v31  ;;  %v3745_v13 = vld [vmem:[#allocation39_spill] sm:$0xff]  ;;  %v1173_v19 = vld [vmem:[#allocation9 + $0x3e0] sm:$0xff] }
 0x1fb   : > { %v740_v53 = vrot.slane %v3262_v59, %v3741_v31  ;;  %v664_v39 = vrot.slane %v604_v2, %v2957_v44  ;;  %v957_v49 = vadd.f32 %v945_v51, %v821_v34  ;;  %v823_v57 = vadd.f32 %v811_v41, %v687_v22  ;;  %v3747_v51 = vld [vmem:[#allocation41_spill] sm:$0xff]  ;;  %v1141_v41 = vld [vmem:[#allocation9 + $0x2e0] sm:$0xff]  ;;  %v1174_v50 = vld [vmem:[#allocation9 + $0x3e8] sm:$0xff] }
 0x1fc   : > { %v1008_v61 = vrot.slane %v3389_v4, %v2964_v47  ;;  %v3744_v7 = vpack.c.bf16 %v3742_v6, %v3743_v45  ;;  %v3746_v60 = vpack.c.bf16 %v3114_v11, %v3745_v13  ;;  %v669_v29 = vmul.f32 %v3249_v0, %v3285_v8  ;;  %v3753_v3 = vld [vmem:[#allocation46_spill] sm:$0xff]  ;;  %v3754_v34 = vld [vmem:[#allocation45_spill] sm:$0xff] }
 0x1fd   : > { %v532_v21 = vrot.slane %v472_v27, %v2961_v46  ;;  %v540_v2 = vrot.slane %v480_v15, %v2961_v46  ;;  %v3749_v43 = vpack.c.bf16 %v3747_v51, %v3748_v9  ;;  %v3752_v37 = vpack.c.bf16 %v3750_v56, %v3751_v33  ;;  %v3763_v13 = vld [vmem:[#allocation49_spill] sm:$0xff]  ;;  %v3765_v51 = vld [vmem:[#allocation59_spill] sm:$0xff] }
 0x1fe   : > { %2105 = vmatpush3.bf16.msra.mxu0 %v3744_v7  ;;  %2137 = vmatpush3.bf16.msra.mxu1 %v3746_v60  ;;  %v671_v63 = vmul.f32 %v644_v42, %v3285_v8  ;;  %v3440_v12 = vadd.f32 %v1000_v35, %v957_v49  ;;  %v959_v11 = vadd.f32 %v947_v58, %v823_v57  ;;  %v1126_v7 = vld [vmem:[#allocation9 + $0x268] sm:$0xff] }
 0x1ff   : > { %2107 = vmatprep.subr.bf16.mxu0 %v3749_v43  ;;  %2139 = vmatprep.subr.bf16.mxu1 %v3752_v37  ;;  %v916_v0 = vrot.slane %v856_v28, %v2967_v48  ;;  %v674_v27 = vmul.f32 %v656_v52, %v3285_v8  ;;  %v868_v46 = vrot.slane %v3189_v36, %v3716_v14  ;;  %v3756_v36 = vld [vmem:[#allocation47_spill] sm:$0xff]  ;;  %v3766_v43 = vld [vmem:[#allocation52_spill] sm:$0xff] }
 0x200   : > { %v876_v15 = vrot.slane %v3262_v59, %v3716_v14  ;;  %v545_v42 = vmul.f32 %v3246_v10, %v3235_v20  ;;  %v547_v58 = vmul.f32 %v3260_v38, %v3235_v20  ;;  %v676_v54 = vmul.f32 %v664_v39, %v3285_v8  ;;  %v3759_v8 = vld [vmem:[#allocation48_spill] sm:$0xff]  ;;  %v3767_v56 = vld [vmem:[#allocation51_spill] sm:$0xff] }
 0x201   : > { %v3453_v28 = vadd.f32 %v1008_v61, %v959_v11  ;;  %v3755_v35 = vpack.c.bf16 %v3753_v3, %v3754_v34  ;;  %v3757_v59 = vpack.c.bf16 %v3152_v24, %v3756_v36  ;;  %v550_v14 = vmul.f32 %v532_v21, %v3235_v20  ;;  %v1158_v21 = vld [vmem:[#allocation9 + $0x368] sm:$0xff]  ;;  %v1175_v11 = vld [vmem:[#allocation9 + $0x3f0] sm:$0xff]  ;;  %v3776_v36 = vld [vmem:[#allocation57_spill] sm:$0xff] }
 0x202   : > { %v792_v22 = vrot.slane %v732_v32, %v2964_v47  ;;  %v800_v10 = vrot.slane %v740_v53, %v2964_v47  ;;  %v3758_v38 = vpack.c.bf16 %v3156_v17, %v3154_v16  ;;  %v3760_v52 = vpack.c.bf16 %v3160_v30, %v3759_v8  ;;  %v1125_v32 = vld [vmem:[#allocation9 + $0x260] sm:$0xff]  ;;  %v3773_v3 = vld [vmem:[#allocation55_spill] sm:$0xff] }
 0x203   : > { %2109 = vmatpush3.bf16.msra.mxu0 %v3755_v35  ;;  %2141 = vmatpush3.bf16.msra.mxu1 %v3757_v59  ;;  %v681_v39 = vadd.f32 %v669_v29, %v545_v42  ;;  %v683_v49 = vadd.f32 %v671_v63, %v547_v58  ;;  %v552_v57 = vmul.f32 %v540_v2, %v3235_v20  ;;  %v3762_v20 = vld [vmem:[#allocation50_spill] sm:$0xff]  ;;  %v1143_v2 = vld [vmem:[#allocation9 + $0x2f0] sm:$0xff]  ;;  %v1144_v63 = vld [vmem:[#allocation9 + $0x2f8] sm:$0xff] }
 0x204   : > { %2111 = vmatprep.subr.bf16.mxu0 %v3758_v38  ;;  %2143 = vmatprep.subr.bf16.mxu1 %v3760_v52  ;;  %v2118_v24 = vpack.c.bf16 %v1142_v18, %v1141_v41  ;;  %v2150_v61 = vpack.c.bf16 %v1174_v50, %v1173_v19  ;;  %v686_v6 = vadd.f32 %v674_v27, %v550_v14  ;;  %v1157_v29 = vld [vmem:[#allocation9 + $0x360] sm:$0xff]  ;;  %v1176_v41 = vld [vmem:[#allocation9 + $0x3f8] sm:$0xff]  ;;  %v1159_v38 = vld [vmem:[#allocation9 + $0x370] sm:$0xff] }
 0x205   : > { %v928_v45 = vrot.slane %v868_v46, %v2967_v48  ;;  %v805_v47 = vmul.f32 %v3252_v23, %v3237_v55  ;;  %v807_v16 = vmul.f32 %v780_v25, %v3237_v55  ;;  %v688_v17 = vadd.f32 %v676_v54, %v552_v57  ;;  %v3772_v54 = vld [vmem:[#allocation56_spill] sm:$0xff]  ;;  %v3775_v35 = vld [vmem:[#allocation58_spill] sm:$0xff]  ;;  %v1160_v52 = vld [vmem:[#allocation9 + $0x378] sm:$0xff] }
 0x206   : > { %v936_v30 = vrot.slane %v876_v15, %v2967_v48  ;;  %v3761_v53 = vpack.c.bf16 %v3173_v40, %v3171_v26  ;;  %v3764_v60 = vpack.c.bf16 %v3762_v20, %v3763_v13  ;;  %v941_v9 = vmul.f32 %v3765_v51, %v3287_v1  ;;  %v3769_v40 = vld [vmem:[#allocation54_spill] sm:$0xff]  ;;  %v3770_v26 = vld [vmem:[#allocation53_spill] sm:$0xff]  ;;  %v1178_v20 = vld [vmem:[#allocation9 + $0x408] sm:$0xff] }
 0x207   : > { %v810_v23 = vmul.f32 %v792_v22, %v3237_v55  ;;  %v812_v25 = vmul.f32 %v800_v10, %v3237_v55  ;;  %v3768_v33 = vpack.c.bf16 %v3766_v43, %v3767_v56  ;;  %v3771_v37 = vpack.c.bf16 %v3769_v40, %v3770_v26  ;;  %v1127_v10 = vld [vmem:[#allocation9 + $0x270] sm:$0xff]  ;;  %v1193_v57 = vld [vmem:[#allocation9 + $0x480] sm:$0xff]  ;;  %v1180_v56 = vld [vmem:[#allocation9 + $0x418] sm:$0xff] }
 0x208   : > { %2113 = vmatpush3.bf16.msra.mxu0 %v3761_v53  ;;  %2145 = vmatpush3.bf16.msra.mxu1 %v3764_v60  ;;  %v817_v27 = vadd.f32 %v805_v47, %v681_v39  ;;  %v819_v46 = vadd.f32 %v807_v16, %v683_v49  ;;  %v943_v15 = vmul.f32 %v916_v0, %v3287_v1  ;;  %v1128_v0 = vld [vmem:[#allocation9 + $0x278] sm:$0xff]  ;;  %v1177_v53 = vld [vmem:[#allocation9 + $0x400] sm:$0xff]  ;;  %v1227_v51 = vld [vmem:[#allocation9 + $0x590] sm:$0xff] }
 0x209   : > { %2115 = vmatprep.subr.bf16.mxu0 %v3768_v33  ;;  %2147 = vmatprep.subr.bf16.mxu1 %v3771_v37  ;;  %v822_v18 = vadd.f32 %v810_v23, %v686_v6  ;;  %v946_v19 = vmul.f32 %v928_v45, %v3287_v1  ;;  %v2120_v50 = vpack.c.bf16 %v1126_v7, %v1125_v32  ;;  %v1194_v6 = vld [vmem:[#allocation9 + $0x488] sm:$0xff]  ;;  %v1225_v45 = vld [vmem:[#allocation9 + $0x580] sm:$0xff]  ;;  %v1179_v43 = vld [vmem:[#allocation9 + $0x410] sm:$0xff] }
 0x20a   : > { %v2152_v55 = vpack.c.bf16 %v1158_v21, %v1157_v29  ;;  %v824_v42 = vadd.f32 %v812_v25, %v688_v17  ;;  %v948_v58 = vmul.f32 %v936_v30, %v3287_v1  ;;  %v3774_v34 = vpack.c.bf16 %v3772_v54, %v3773_v3  ;;  %v1226_v32 = vld [vmem:[#allocation9 + $0x588] sm:$0xff]  ;;  %v1209_v60 = vld [vmem:[#allocation9 + $0x500] sm:$0xff]  ;;  %v1211_v33 = vld [vmem:[#allocation9 + $0x510] sm:$0xff] }
 0x20b   : > { %v3777_v59 = vpack.c.bf16 %v3775_v35, %v3776_v36  ;;  %v2122_v14 = vpack.c.bf16 %v1144_v63, %v1143_v2  ;;  %v2154_v22 = vpack.c.bf16 %v1176_v41, %v1175_v11  ;;  %v984_v8 = vrot.slane %v3709_v62, %v3731_v5  ;;  %v1210_v29 = vld [vmem:[#allocation9 + $0x508] sm:$0xff]  ;;  %v1196_v2 = vld [vmem:[#allocation9 + $0x498] sm:$0xff]  ;;  %v1197_v11 = vld [vmem:[#allocation9 + $0x4a0] sm:$0xff] }
 0x20c   : > { %2117 = vmatpush3.bf16.msra.mxu0 %v3774_v34  ;;  %v953_v1 = vadd.f32 %v941_v9, %v817_v27  ;;  %v955_v39 = vadd.f32 %v943_v15, %v819_v46  ;;  %v992_v49 = vrot.slane %v3709_v62, %v3741_v31  ;;  %v958_v7 = vadd.f32 %v946_v19, %v822_v18  ;;  %v1212_v63 = vld [vmem:[#allocation9 + $0x518] sm:$0xff]  ;;  %v1198_v41 = vld [vmem:[#allocation9 + $0x4a8] sm:$0xff]  ;;  %v1229_v46 = vld [vmem:[#allocation9 + $0x5a0] sm:$0xff] }
 0x20d   : > { %2149 = vmatpush3.bf16.msra.mxu1 %v3777_v59  ;;  %2119 = vmatprep.subr.bf16.mxu0 %v2118_v24  ;;  %v1004_v47 = vrot.slane %v3389_v4, %v2957_v44  ;;  %v960_v16 = vadd.f32 %v948_v58, %v824_v42  ;;  %v1012_v5 = vrot.slane %v3389_v4, %v2967_v48  ;;  %v1195_v44 = vld [vmem:[#allocation9 + $0x490] sm:$0xff]  ;;  %v1228_v48 = vld [vmem:[#allocation9 + $0x598] sm:$0xff]  ;;  %v1230_v15 = vld [vmem:[#allocation9 + $0x5a8] sm:$0xff] }
 0x20e   : > { %2151 = vmatprep.subr.bf16.mxu1 %v2150_v61  ;;  %v2124_v24 = vpack.c.bf16 %v1128_v0, %v1127_v10  ;;  %v2156_v61 = vpack.c.bf16 %v1160_v52, %v1159_v38  ;;  %v2158_v17 = vpack.c.bf16 %v1194_v6, %v1193_v57  ;;  %v1029_v62 = vadd.f32 %v984_v8, %v953_v1  ;;  %v1182_v42 = vld [vmem:[#allocation9 + $0x428] sm:$0xff]  ;;  %v1213_v58 = vld [vmem:[#allocation9 + $0x520] sm:$0xff]  ;;  %v1199_v34 = vld [vmem:[#allocation9 + $0x4b0] sm:$0xff] }
 0x20f   : > { %v1031_v31 = vadd.f32 %v992_v49, %v955_v39  ;;  %v2190_v30 = vpack.c.bf16 %v1226_v32, %v1225_v45  ;;  %v1034_v13 = vadd.f32 %v1004_v47, %v958_v7  ;;  %v1036_v21 = vadd.f32 %v1012_v5, %v960_v16  ;;  %v1214_v3 = vld [vmem:[#allocation9 + $0x528] sm:$0xff]  ;;  %v1200_v35 = vld [vmem:[#allocation9 + $0x4b8] sm:$0xff]  ;;  %v1231_v36 = vld [vmem:[#allocation9 + $0x5b0] sm:$0xff] }
 0x210   : > { %2121 = vmatpush3.bf16.msra.mxu0 %v2120_v50  ;;  %v2160_v4 = vpack.c.bf16 %v1178_v20, %v1177_v53  ;;  %v1041_v9 = vmax.f32 %v1029_v62, 0.0  ;;  %v2192_v25 = vpack.c.bf16 %v1210_v29, %v1209_v60  ;;  %v2162_v26 = vpack.c.bf16 %v1196_v2, %v1195_v44  ;;  %v1232_v59 = vld [vmem:[#allocation9 + $0x5b8] sm:$0xff]  ;;  %v1183_v0 = vld [vmem:[#allocation9 + $0x430] sm:$0xff]  ;;  %v1201_v39 = vld [vmem:[#allocation9 + $0x4c0] sm:$0xff] }
 0x211   : > { %2153 = vmatpush3.bf16.msra.mxu1 %v2152_v55  ;;  %2123 = vmatprep.subr.bf16.mxu0 %v2122_v14  ;;  %v1043_v23 = vmax.f32 %v1031_v31, 0.0  ;;  %v1046_v40 = vmax.f32 %v1034_v13, 0.0  ;;  %v2194_v37 = vpack.c.bf16 %v1228_v48, %v1227_v51  ;;  %v1048_v27 = vmax.f32 %v1036_v21, 0.0  ;;  %v1181_v55 = vld [vmem:[#allocation9 + $0x420] sm:$0xff]  ;;  %v1184_v38 = vld [vmem:[#allocation9 + $0x438] sm:$0xff]  ;;  %v1215_v8 = vld [vmem:[#allocation9 + $0x530] sm:$0xff] }
 0x212   : > { %2155 = vmatprep.subr.bf16.mxu1 %v2154_v22  ;;  %v2164_v18 = vpack.c.bf16 %v1180_v56, %v1179_v43  ;;  %v2196_v19 = vpack.c.bf16 %v1212_v63, %v1211_v33  ;;  %v2166_v50 = vpack.c.bf16 %v1198_v41, %v1197_v11  ;;  %v2198_v54 = vpack.c.bf16 %v1230_v15, %v1229_v46  ;;  %v1216_v1 = vld [vmem:[#allocation9 + $0x538] sm:$0xff]  ;;  %v1202_v49 = vld [vmem:[#allocation9 + $0x4c8] sm:$0xff]  ;;  %v1233_v57 = vld [vmem:[#allocation9 + $0x5c0] sm:$0xff] }
 0x213   : > { %v2168_v14 = vpack.c.bf16 %v1182_v42, %v1181_v55  ;;  %v2200_v22 = vpack.c.bf16 %v1214_v3, %v1213_v58  ;;  %v2170_v10 = vpack.c.bf16 %v1200_v35, %v1199_v34  ;;  %v2202_v52 = vpack.c.bf16 %v1232_v59, %v1231_v36  ;;  %v1234_v6 = vld [vmem:[#allocation9 + $0x5c8] sm:$0xff]  ;;  %v1185_v47 = vld [vmem:[#allocation9 + $0x440] sm:$0xff]  ;;  %v1204_v62 = vld [vmem:[#allocation9 + $0x4d8] sm:$0xff] }
 0x214   : > { %2125 = vmatpush3.bf16.msra.mxu0 %v2124_v24  ;;  %v2172_v45 = vpack.c.bf16 %v1184_v38, %v1183_v0  ;;  %v2204_v32 = vpack.c.bf16 %v1216_v1, %v1215_v8  ;;  %v2174_v7 = vpack.c.bf16 %v1202_v49, %v1201_v39  ;;  %v1186_v16 = vld [vmem:[#allocation9 + $0x448] sm:$0xff]  ;;  %v1217_v5 = vld [vmem:[#allocation9 + $0x540] sm:$0xff]  ;;  %v2206_v24 = vpack.c.bf16 %v1234_v6, %v1233_v57  ;;  %v1235_v31 = vld [vmem:[#allocation9 + $0x5d0] sm:$0xff] }
 0x215   : > { %2157 = vmatpush3.bf16.msra.mxu1 %v2156_v61  ;;  %2159 = vmatprep.subr.bf16.mxu0 %v2158_v17  ;;  %v1218_v61 = vld [vmem:[#allocation9 + $0x548] sm:$0xff]  ;;  %v1203_v17 = vld [vmem:[#allocation9 + $0x4d0] sm:$0xff]  ;;  %v2176_v53 = vpack.c.bf16 %v1186_v16, %v1185_v47  ;;  %v1188_v29 = vld [vmem:[#allocation9 + $0x458] sm:$0xff]  ;;  %v1045_v34 = vmax.f32 %v3440_v12, 0.0  ;;  %v1047_v35 = vmax.f32 %v3453_v28, 0.0 }
 0x216   : > { %2191 = vmatprep.subr.bf16.mxu1 %v2190_v30  ;;  %v1236_v30 = vld [vmem:[#allocation9 + $0x5d8] sm:$0xff]  ;;  %v2208_v20 = vpack.c.bf16 %v1218_v61, %v1217_v5  ;;  %v2178_v13 = vpack.c.bf16 %v1204_v62, %v1203_v17  ;;  %v1187_v60 = vld [vmem:[#allocation9 + $0x450] sm:$0xff]  ;;  %v1205_v51 = vld [vmem:[#allocation9 + $0x4e0] sm:$0xff] }
 0x217   : > { %1453 = vmatmul.mubr.f32.vlgmr.msra.gmra.mrb[2].mxu0 %v1041_v9  ;;  %v1219_v44 = vld [vmem:[#allocation9 + $0x550] sm:$0xff]  ;;  %v2210_v21 = vpack.c.bf16 %v1236_v30, %v1235_v31  ;;  %v1220_v2 = vld [vmem:[#allocation9 + $0x558] sm:$0xff]  ;;  %v1206_v48 = vld [vmem:[#allocation9 + $0x4e8] sm:$0xff] }
 0x218   : > { %1523 = vmatmul.mubr.f32.vlgmr.msra.gmra.mrb[2].mxu1 %v1043_v23  ;;  %2161 = vmatpush3.bf16.msra.mxu0 %v2160_v4  ;;  %v1237_v4 = vld [vmem:[#allocation9 + $0x5e0] sm:$0xff]  ;;  %v1238_v9 = vld [vmem:[#allocation9 + $0x5e8] sm:$0xff]  ;;  %v2180_v23 = vpack.c.bf16 %v1188_v29, %v1187_v60  ;;  %v2182_v43 = vpack.c.bf16 %v1206_v48, %v1205_v51  ;;  %v1207_v63 = vld [vmem:[#allocation9 + $0x4f0] sm:$0xff] }
 0x219   : > { %1592 = vmatprep.mubr.f32.mxu0 %v1046_v40  ;;  %2193 = vmatpush3.bf16.msra.mxu1 %v2192_v25  ;;  %v2212_v25 = vpack.c.bf16 %v1220_v2, %v1219_v44  ;;  %v1189_v56 = vld [vmem:[#allocation9 + $0x460] sm:$0xff]  ;;  %v1190_v33 = vld [vmem:[#allocation9 + $0x468] sm:$0xff]  ;;  %v1208_v11 = vld [vmem:[#allocation9 + $0x4f8] sm:$0xff] }
 0x21a   : > { %1662 = vmatprep.mubr.f32.mxu1 %v1048_v27  ;;  %2163 = vmatprep.subr.bf16.mxu0 %v2162_v26  ;;  %v1221_v40 = vld [vmem:[#allocation9 + $0x560] sm:$0xff]  ;;  %v2214_v26 = vpack.c.bf16 %v1238_v9, %v1237_v4  ;;  %v1239_v41 = vld [vmem:[#allocation9 + $0x5f0] sm:$0xff]  ;;  %v1240_v27 = vld [vmem:[#allocation9 + $0x5f8] sm:$0xff]  ;;  %v2184_v46 = vpack.c.bf16 %v1190_v33, %v1189_v56 }
 0x21b   : > { %2195 = vmatprep.subr.bf16.mxu1 %v2194_v37  ;;  %v1222_v37 = vld [vmem:[#allocation9 + $0x568] sm:$0xff]  ;;  %v2218_v55 = vpack.c.bf16 %v1240_v27, %v1239_v41  ;;  %v1223_v42 = vld [vmem:[#allocation9 + $0x570] sm:$0xff]  ;;  %v1224_v58 = vld [vmem:[#allocation9 + $0x578] sm:$0xff] }
 0x21c   : > { %2165 = vmatpush3.bf16.msra.mxu0 %v2164_v18  ;;  %v2216_v15 = vpack.c.bf16 %v1222_v37, %v1221_v40  ;;  %v2186_v18 = vpack.c.bf16 %v1208_v11, %v1207_v63  ;;  %v2220_v3 = vpack.c.bf16 %v1224_v58, %v1223_v42 }
 0x21d   : > { %2197 = vmatpush3.bf16.msra.mxu1 %v2196_v19  ;;  %2167 = vmatprep.subr.bf16.mxu0 %v2166_v50  ;;  %v1191_v19 = vld [vmem:[#allocation9 + $0x470] sm:$0xff]  ;;  %v1192_v50 = vld [vmem:[#allocation9 + $0x478] sm:$0xff] }
 0x21e   : > { %2199 = vmatprep.subr.bf16.mxu1 %v2198_v54  ;;  %v2188_v54 = vpack.c.bf16 %v1192_v50, %v1191_v19 }
 0x220   : > { %2169 = vmatpush3.bf16.msra.mxu0 %v2168_v14  ;;  %v1814_v14 = vld [vmem:[%s3584_s4] ss:$0 sm:$0xff] }
 0x221   : > { %2201 = vmatpush3.bf16.msra.mxu1 %v2200_v22  ;;  %2171 = vmatprep.subr.bf16.mxu0 %v2170_v10 }
 0x222   : > { %2203 = vmatprep.subr.bf16.mxu1 %v2202_v52 }
 0x224   : > { %2173 = vmatpush3.bf16.msra.mxu0 %v2172_v45 }
 0x225   : > { %2205 = vmatpush3.bf16.msra.mxu1 %v2204_v32  ;;  %2175 = vmatprep.subr.bf16.mxu0 %v2174_v7 }
 0x226   : > { %2207 = vmatprep.subr.bf16.mxu1 %v2206_v24 }
 0x228   : > { %2177 = vmatpush3.bf16.msra.mxu0 %v2176_v53 }
 0x229   : > { %2209 = vmatpush3.bf16.msra.mxu1 %v2208_v20  ;;  %2179 = vmatprep.subr.bf16.mxu0 %v2178_v13 }
 0x22a   : > { %2211 = vmatprep.subr.bf16.mxu1 %v2210_v21 }
 0x22c   : > { %2181 = vmatpush3.bf16.msra.mxu0 %v2180_v23 }
 0x22d   : > { %2213 = vmatpush3.bf16.msra.mxu1 %v2212_v25  ;;  %2183 = vmatprep.subr.bf16.mxu0 %v2182_v43 }
 0x22e   : > { %2215 = vmatprep.subr.bf16.mxu1 %v2214_v26 }
 0x230   : > { %2185 = vmatpush3.bf16.msra.mxu0 %v2184_v46 }
 0x231   : > { %2217 = vmatpush3.bf16.msra.mxu1 %v2216_v15  ;;  %2187 = vmatprep.subr.bf16.mxu0 %v2186_v18 }
 0x232   : > { %2219 = vmatprep.subr.bf16.mxu1 %v2218_v55 }
 0x234   : > { %2189 = vmatpush3.bf16.msra.mxu0 %v2188_v54 }
 0x235   : > { %2221 = vmatpush3.bf16.msra.mxu1 %v2220_v3 }
 0x237   : > { %1593 = vmatmul.mubr.f32.vlgmr.msra.gmra.mrb[4].mxu0 %v1045_v34 }
 0x238   : > { %1663 = vmatmul.mubr.f32.vlgmr.msra.gmra.mrb[4].mxu1 %v1047_v35 }
 0x2c4   : > { %v1852_v36 = vpop.f32.mrb[0].mxu0  ;;  %v1887_v59 = vpop.f32.mrb[0].mxu1 }
 0x2c5   : > { %v1853_v22 = vpop.f32.mrb[1].mxu0  ;;  %v1888_v10 = vpop.f32.mrb[1].mxu1 }
 0x2c6   : > { %v1854_v0 = vadd.f32 %v1853_v22, %v1852_v36  ;;  %v1889_v38 = vadd.f32 %v1888_v10, %v1887_v59 }
 0x2c8   : > { %v1315_v8 = vadd.f32 %v1854_v0, %v1814_v14 }
 0x2ca   : > { %v1385_v52 = vadd.f32 %v1889_v38, %v1315_v8 }
 0x2ea   : > { %v1922_v1 = vpop.f32.mrb[2].mxu0 }
 0x2eb   : > { %v1957_v39 = vpop.f32.mrb[2].mxu1  ;;  %v1923_v12 = vpop.f32.mrb[3].mxu0 }
 0x2ec   : > { %v1958_v49 = vpop.f32.mrb[3].mxu1  ;;  %v1924_v28 = vadd.f32 %v1923_v12, %v1922_v1 }
 0x2ed   : > { %v1959_v57 = vadd.f32 %v1958_v49, %v1957_v39 }
 0x2ee   : > { %v1455_v6 = vadd.f32 %v1924_v28, %v1385_v52 }
 0x2f0   : > { %v1525_v45 = vadd.f32 %v1959_v57, %v1455_v6 }
 0x30a   : > { %v1992_v32 = vpop.f32.mrb[4].mxu0 }
 0x30b   : > { %v2027_v7 = vpop.f32.mrb[4].mxu1  ;;  %v1993_v47 = vpop.f32.mrb[5].mxu0 }
 0x30c   : > { %v1994_v16 = vadd.f32 %v1993_v47, %v1992_v32  ;;  %v2028_v5 = vpop.f32.mrb[5].mxu1 }
 0x30d   : > { %v2029_v24 = vadd.f32 %v2028_v5, %v2027_v7 }
 0x30e   : > { %v1595_v61 = vadd.f32 %v1994_v16, %v1525_v45 }
 0x310   : > { %v1665_v17 = vadd.f32 %v2029_v24, %v1595_v61 }
 0x312   : > { %1668 = vst [vmem:[%s298_s10] sm:$0xff] %v1665_v17 }
 0x313 PF: > { %s3778_s17 = sld [smem:[#allocation18_spill]]  ;;  %s1816_s8 = sshll.u32 %s2602_s25, 7 }
 0x314   : > { %s3779_s16 = sld [smem:[#allocation63_spill]]  ;;  %s1683_s3 = sshll.u32 %s298_s10, 4  ;;  %s1684_s3 = int_to_ptr.vmem [resolvable:$true] %s1683_s3 }
 0x315   : > { %s1670_s29 = scalar_lea.sflag [#allocation5], %s296_s2  ;;  %s2484_s14 = scalar_lea.vmem %s1684_s3, 128 }
 0x316   : > { %p2485_p2 = scmp.ne.s32.totalorder %s1684_s3, %s2484_s14  ;;  %s2630_s15 = smov [#allocation11]  }
 0x317   : > { %s2488_s18 = sshll.u32 %s2630_s15, 4  ;;  %s2489_s18 = int_to_ptr.vmem [resolvable:$false] %s2488_s18 }
 0x318   : > { %s2490_s9 = scalar_lea.vmem %s2489_s18, 256  ;;  %p2491_p6 = scmp.lt.s32.totalorder %s1684_s3, %s2489_s18 }
 0x319   : > { %p3780_p9 = scmp.ne.s32.totalorder %s3778_s17, 0  ;;  %p2492_p10 = scmp.lt.s32.totalorder %s2490_s9, %s2484_s14 }
 0x31a   : > { %s3520_s30 = scalar_lea.hbm %s3779_s16, %s1816_s8 }
 0x31b   : > { %p2486_p3 = pnand %p2485_p2, %p3780_p9  ;;  %p2493_p7 = por %p2492_p10, %p2491_p6 }
 0x31d   : > { %p2487_p5 = pneg %p2486_p3 }
 0x31f   : > { %p2494_p4 = pnand %p2493_p7, %p2487_p5 }
 0x321   : > { %2497 = shalt.err (!%p2494_p4)
}
 0x322   : > { %s2498_s25 = scalar_lea.hbm %s3520_s30, 128  ;;  %s2502_s13 = scalar_lea.hbm %s3779_s16, 256 }
 0x323   : > { %p2499_p11 = scmp.ne.s32.totalorder %s3520_s30, %s2498_s25  ;;  %p2503_p13 = scmp.lt.u32.totalorder %s3520_s30, %s3779_s16 }
 0x324   : > { %p2504_p12 = scmp.lt.u32.totalorder %s2502_s13, %s2498_s25  ;;  %p2506_p2 = scmp.lt.u32.totalorder %s2498_s25, %s3520_s30 }
 0x325   : > { %p2500_p0 = pnand %p2499_p11, %p3780_p9 }
 0x326   : > { %p2505_p1 = por %p2504_p12, %p2503_p13 }
 0x327   : > { %p2501_p8 = pneg %p2500_p0 }
 0x328   : > { %p2507_p3 = por %p2506_p2, %p2505_p1 }
 0x32a   : > { %p2508_p5 = pnand %p2507_p3, %p2501_p8 }
 0x32c   : > { %2511 = shalt.err (!%p2508_p5)
}
 0x32d   : > { %2236 = dma.vmem_to_hbm [thread:$0]  (%p3780_p9), %s1684_s3, 128, %s3520_s30, %s1670_s29  }
 0x32e PF: > { %s3781_s7 = sld [smem:[#allocation17_spill]]  ;;  %s3782_s8 = sld [smem:[#allocation16_spill]] }
 0x32f   : > { %s3783_s28 = sld [smem:[#allocation19_spill]] }
 0x334   : > { %p2263_p6 = scmp.ge.s32.totalorder %s3781_s7, 2  ;;  %s1695_s12 = sand.u32 1, %s3782_s8  }
 0x335   : > { %p3784_p10 = scmp.ne.s32.totalorder %s3783_s28, 0  ;;  %s1696_s14 = scalar_lea.sflag [#allocation5], %s1695_s12 }
 0x337   : > { %p2253_p7 = pnand %p2263_p6, %p3784_p10 }
 0x339   : > { %2569 = dma.done.wait (!%p2253_p7), %s1696_s14, 128  }
 0x33a   : > { %2571 = vsyncadd (!%p2253_p7), %s1696_s14, 4294967168  ;;  %s23_s28 = sadd.s32 1, %s3781_s7   ;;  %s3785_s17 = smov %s2865_s21 }
 0x33b   : > { %p20_p4 = scmp.ge.s32.totalorder %s23_s28, 6   ;;  %s3786_s18 = smov %s2578_s19 }
 0x33c   : > { %s3787_s19 = smov %s2582_s20  ;;  %s3788_s20 = smov %s2860_s6 }
 0x33d   : > { %s3789_s21 = smov %s2590_s22  ;;  %s3790_s22 = smov %s2594_s23 }
 0x33e   : > { %s3791_s23 = smov %s3785_s17  ;;  %s3792_s24 = smov %s2606_s26 }
 0x33f   : > { %s3793_s25 = smov %s2610_s27  ;;  %s3794_s26 = smov %s3797_s11 }
 0x340   : > { %s3795_s27 = smov %s3801_s5  ;;  %22 = sbr.rel (!%p20_p4) target bundleno = 16 (0x10), region = 105 }
 0x347   :  { %1701 = vsyncpa [#allocation4], 1 }
 0x348   :  { %1703 = vsyncpa [#allocation4 + $0x1], 1 }
 0x349   :  { %1704 = vsyncpa [#allocation7], 1 }
 0x34a   :  { %1705 = vsyncpa [#allocation10], 1 }
 0x34b   :  { %1706 = vsyncpa [#allocation5], 1 }
 0x34c   :  { %1708 = vsyncpa [#allocation5 + $0x1], 1 }

</bundles_post_ra>
